<compile_context>
chip_gen: v6e
topology: v6e:2x2x1
jax: 0.10.0
libtpu: 0.0.40
codegen_flags: <defaults>
</compile_context>

<pallas_src>
import jax
import jax.numpy as jnp
from jax.experimental import pallas as pl
from jax.experimental.pallas import tpu as pltpu


def _round_up(x, m):
    return ((x + m - 1) // m) * m


def _make_gru_kernel(tb, want_seq):
    """Pallas kernel for the GRU recurrence over a (batch, time) grid.

    Inputs (per grid step):
      gx{r,z,n}_ref : (tb, bt, H) bf16  precomputed input projections per gate
      wh{r,z,n}_ref : (H, H)      bf16  hidden-to-hidden weights (transposed)
      bhn_ref       : (1, H)      f32   b_hh for the n gate (cannot be folded)
      len_ref       : (bt, 1)     i32   sequence lengths
    Outputs:
      [seq_ref (tb, bt, H) bf16]   per-step hidden (only for non-last layers)
      final_ref (bt, H) f32        L2-normalized hidden at t = length - 1
    Scratch:
      h_scr (bt, H) f32            hidden state carried across time blocks
    """

    def kernel(gxr_ref, gxz_ref, gxn_ref, whr_ref, whz_ref, whn_ref,
               bhn_ref, len_ref, *outs):
        if want_seq:
            seq_ref, final_ref, h_scr = outs
        else:
            final_ref, h_scr = outs

        t_blk = pl.program_id(1)
        n_tblk = pl.num_programs(1)

        @pl.when(t_blk == 0)
        def _():
            h_scr[...] = jnp.zeros_like(h_scr)

        h = h_scr[...]                      # (bt, H) f32, carried in registers
        lens = len_ref[...]                 # (bt, 1) int32
        whr = whr_ref[...]                  # (H, H) bf16
        whz = whz_ref[...]
        whn = whn_ref[...]
        bhn = bhn_ref[...]                  # (1, H) f32
        t_base = t_blk * tb

        # Small static unroll over the time block; h never round-trips VMEM
        # inside the loop.
        for j in range(tb):
            hb = h.astype(jnp.bfloat16)
            ar = jnp.dot(hb, whr, preferred_element_type=jnp.float32)
            az = jnp.dot(hb, whz, preferred_element_type=jnp.float32)
            an = jnp.dot(hb, whn, preferred_element_type=jnp.float32)
            # gx already contains b_ih (all gates) and b_hh for r/z.
            r = jax.nn.sigmoid(gxr_ref[j].astype(jnp.float32) + ar)
            z = jax.nn.sigmoid(gxz_ref[j].astype(jnp.float32) + az)
            n = jnp.tanh(gxn_ref[j].astype(jnp.float32) + r * (an + bhn))
            h_new = n + z * (h - n)         # == (1 - z) * n + z * h
            # Only advance the hidden state on valid (non-padded) steps, so the
            # carry ends at h_{length-1} (== torch.gather(..., lengths-1)).
            valid = (t_base + j) < lens     # (bt, 1)
            h = jnp.where(valid, h_new, h)
            if want_seq:
                seq_ref[j] = h.astype(seq_ref.dtype)

        h_scr[...] = h

        @pl.when(t_blk == n_tblk - 1)
        def _():
            ssq = jnp.sum(h * h, axis=-1, keepdims=True)
            final_ref[...] = (h * jax.lax.rsqrt(ssq + 1e-12)).astype(
                final_ref.dtype)

    return kernel


def gru_layer(gx_r, gx_z, gx_n, w_hr_t, w_hz_t, w_hn_t, b_hn, lengths_col,
              *, tb, want_seq):
    """Run one GRU layer. gx_* are [T_pad, B_pad, H] precomputed projections."""
    T_pad, B_pad, H = gx_r.shape
    assert T_pad % tb == 0
    # Split the (padded) batch into two blocks when it is large enough so the
    # "parallel" batch grid axis can be sharded across TensorCores (v7x).
    bt = B_pad if B_pad <= 8 else B_pad // 2
    n_b = B_pad // bt
    n_t = T_pad // tb

    gx_spec = pl.BlockSpec((tb, bt, H), lambda b, t: (t, b, 0))
    w_spec = pl.BlockSpec((H, H), lambda b, t: (0, 0))
    final_spec = pl.BlockSpec((bt, H), lambda b, t: (b, 0))
    final_shape = jax.ShapeDtypeStruct((B_pad, H), jnp.float32)

    if want_seq:
        out_shape = (jax.ShapeDtypeStruct((T_pad, B_pad, H), jnp.bfloat16),
                     final_shape)
        out_specs = (gx_spec, final_spec)
    else:
        out_shape = final_shape
        out_specs = final_spec

    outs = pl.pallas_call(
        _make_gru_kernel(tb, want_seq),
        out_shape=out_shape,
        grid_spec=pltpu.PrefetchScalarGridSpec(
            num_scalar_prefetch=0,
            grid=(n_b, n_t),
            in_specs=[
                gx_spec, gx_spec, gx_spec,                      # gx_r, gx_z, gx_n
                w_spec, w_spec, w_spec,                         # W_hr^T, W_hz^T, W_hn^T
                pl.BlockSpec((1, H), lambda b, t: (0, 0)),      # b_hh (n gate)
                pl.BlockSpec((bt, 1), lambda b, t: (b, 0)),     # lengths
            ],
            out_specs=out_specs,
            scratch_shapes=[pltpu.VMEM((bt, H), jnp.float32)],
        ),
        compiler_params=pltpu.CompilerParams(
            dimension_semantics=("parallel", "arbitrary"),
            vmem_limit_bytes=32 * 1024 * 1024,
        ),
    )(gx_r, gx_z, gx_n, w_hr_t, w_hz_t, w_hn_t, b_hn, lengths_col)

    if want_seq:
        seq_out, final_out = outs
        return seq_out, final_out
    return outs


class EncoderTextGlobalPallas:
    """JAX/Pallas re-implementation of EncoderTextGlobal's forward pass."""

    TB = 8  # timesteps per grid step

    def __init__(self, vocab_size, word_dim, embed_size, num_layers,
                 use_bi_gru=False, text_norm=True, dropout=0.0, key=None):
        # TODO(synk): bidirectional GRU (use_bi_gru=True) not implemented.
        assert not use_bi_gru, "only unidirectional GRU implemented"
        self.embed_size = embed_size
        self.text_norm = text_norm   # l2norm applied once (idempotent) either way
        self.num_layers = num_layers
        del dropout                  # inter-layer dropout is 0 / eval-mode

        key = jax.random.PRNGKey(0) if key is None else key
        keys = jax.random.split(key, 1 + 4 * num_layers)

        # nn.Embedding weight init: uniform(-0.1, 0.1)
        self.embed_w = jax.random.uniform(
            keys[0], (vocab_size, word_dim), jnp.float32, -0.1, 0.1)

        H = embed_size
        k = 1.0 / jnp.sqrt(float(H))   # nn.GRU default init
        self.layers = []
        for layer in range(num_layers):
            d_in = word_dim if layer == 0 else H
            kw = keys[1 + 4 * layer: 1 + 4 * (layer + 1)]
            w_ih = jax.random.uniform(kw[0], (3 * H, d_in), jnp.float32, -k, k)
            w_hh = jax.random.uniform(kw[1], (3 * H, H), jnp.float32, -k, k)
            b_ih = jax.random.uniform(kw[2], (3 * H,), jnp.float32, -k, k)
            b_hh = jax.random.uniform(kw[3], (3 * H,), jnp.float32, -k, k)
            # Fold b_hh of the r/z gates into the precomputed input projection;
            # b_hh of the n gate must stay in-kernel (it is multiplied by r).
            bias_x = b_ih + jnp.concatenate(
                [b_hh[:2 * H], jnp.zeros((H,), jnp.float32)])
            self.layers.append(dict(
                wih_t=w_ih.T.astype(jnp.bfloat16),              # (d_in, 3H)
                bias_x=bias_x.reshape(1, 3 * H),                # (1, 3H) f32
                whr_t=w_hh[0:H].T.astype(jnp.bfloat16),         # (H, H)
                whz_t=w_hh[H:2 * H].T.astype(jnp.bfloat16),     # (H, H)
                whn_t=w_hh[2 * H:3 * H].T.astype(jnp.bfloat16), # (H, H)
                bhn=b_hh[2 * H:3 * H].reshape(1, H),            # (1, H) f32
            ))

    def _input_projection(self, x_seq, p):
        """One full-width matmul over ALL timesteps (off the serial path)."""
        T_, B_, D = x_seq.shape
        H = self.embed_size
        gx = jnp.dot(x_seq.astype(jnp.bfloat16).reshape(T_ * B_, D), p["wih_t"],
                     preferred_element_type=jnp.float32)
        gx = gx.reshape(T_, B_, 3 * H) + p["bias_x"]
        return (gx[..., 0:H].astype(jnp.bfloat16),
                gx[..., H:2 * H].astype(jnp.bfloat16),
                gx[..., 2 * H:3 * H].astype(jnp.bfloat16))

    def __call__(self, tokens, lengths):
        # tokens: [B, T] int32, lengths: [B] (1 <= lengths[b] <= T)
        B, T = tokens.shape
        tb = self.TB
        T_pad = _round_up(T, tb)
        B_pad = 8 if B <= 8 else _round_up(B, 16)

        tokens_p = jnp.pad(tokens, ((0, B_pad - B), (0, T_pad - T)))
        lengths_p = jnp.pad(lengths.astype(jnp.int32), (0, B_pad - B))
        lengths_col = lengths_p.reshape(-1, 1)

        # Time-major embedding gather: [T_pad, B_pad, D] directly.
        x_seq = jnp.take(self.embed_w, tokens_p.T, axis=0)

        final = None
        for i, p in enumerate(self.layers):
            gx_r, gx_z, gx_n = self._input_projection(x_seq, p)
            last = i == self.num_layers - 1
            out = gru_layer(gx_r, gx_z, gx_n,
                            p["whr_t"], p["whz_t"], p["whn_t"], p["bhn"],
                            lengths_col, tb=tb, want_seq=not last)
            if last:
                final = out
            else:
                x_seq, final = out
        # torch does l2norm(out, 1) and then (if text_norm) l2norm(out, -1);
        # same axis for a 2-D tensor and idempotent -> one in-kernel normalize.
        return final[:B]                                    # [B, embed_size]


if __name__ == "__main__":
    vocab_size, word_dim, embed_size, num_layers = 50, 32, 32, 1
    B, T = 2, 8

    key = jax.random.PRNGKey(0)
    k_model, k_tok = jax.random.split(key)

    enc = EncoderTextGlobalPallas(vocab_size, word_dim, embed_size, num_layers,
                                  use_bi_gru=False, text_norm=True, key=k_model)

    tokens = jax.random.randint(k_tok, (B, T), 0, vocab_size, dtype=jnp.int32)
    lengths = jnp.array([8, 5], dtype=jnp.int32)

    out = jax.block_until_ready(enc(tokens, lengths))

    assert out.shape == (B, embed_size)
    assert bool(jnp.all(jnp.isfinite(out)))
    # Rows must be L2-normalized.
    assert bool(jnp.allclose(jnp.linalg.norm(out, axis=-1), 1.0, atol=1e-3))
    print("KERNEL_OK")
</pallas_src>

<mosaic_0001>
module attributes {stable_mosaic.version = 11 : i64} {
  func.func @kernel(%arg0: i32, %arg1: i32, %arg2: memref<8x8x32xbf16, #tpu.memory_space<vmem>>, %arg3: memref<8x8x32xbf16, #tpu.memory_space<vmem>>, %arg4: memref<8x8x32xbf16, #tpu.memory_space<vmem>>, %arg5: memref<32x32xbf16, #tpu.memory_space<vmem>>, %arg6: memref<32x32xbf16, #tpu.memory_space<vmem>>, %arg7: memref<32x32xbf16, #tpu.memory_space<vmem>>, %arg8: memref<1x32xf32, #tpu.memory_space<vmem>>, %arg9: memref<8x1xi32, #tpu.memory_space<vmem>>, %arg10: memref<8x32xf32, #tpu.memory_space<vmem>>, %arg11: memref<8x32xf32, #tpu.memory_space<vmem>>) attributes {dimension_semantics = [#tpu.dimension_semantics<parallel>, #tpu.dimension_semantics<arbitrary>], iteration_bounds = array<i64: 1, 1>, scalar_prefetch = 0 : i64, scratch_operands = 1 : i64, tpu.core_type = #tpu.core_type<tc>, window_params = [{transform_indices = @transform_0, window_bounds = array<i64: 8, 8, 32>}, {transform_indices = @transform_1, window_bounds = array<i64: 8, 8, 32>}, {transform_indices = @transform_2, window_bounds = array<i64: 8, 8, 32>}, {pipeline_mode = #tpu.pipeline_mode<synchronous>, transform_indices = @transform_3, window_bounds = array<i64: 32, 32>}, {pipeline_mode = #tpu.pipeline_mode<synchronous>, transform_indices = @transform_4, window_bounds = array<i64: 32, 32>}, {pipeline_mode = #tpu.pipeline_mode<synchronous>, transform_indices = @transform_5, window_bounds = array<i64: 32, 32>}, {pipeline_mode = #tpu.pipeline_mode<synchronous>, transform_indices = @transform_6, window_bounds = array<i64: 1, 32>}, {transform_indices = @transform_7, window_bounds = array<i64: 8, 1>}, {transform_indices = @transform_8, window_bounds = array<i64: 8, 32>}]} {
    %c0_i32 = arith.constant 0 : i32
    %0 = arith.cmpi eq, %arg1, %c0_i32 : i32
    %1 = arith.extui %0 : i1 to i32
    %c0_i32_0 = arith.constant 0 : i32
    %2 = arith.cmpi ne, %1, %c0_i32_0 : i32
    scf.if %2 {
      %cst_121 = arith.constant 0.000000e+00 : f32
      %326 = vector.broadcast %cst_121 : f32 to vector<8x32xf32>
      %c0_122 = arith.constant 0 : index
      %c0_123 = arith.constant 0 : index
      %327 = vector.load %arg11[%c0_122, %c0_123] : memref<8x32xf32, #tpu.memory_space<vmem>>, vector<8x32xf32>
      tpu.vector_store %arg11[%c0_122, %c0_123], %326 {strides = array<i32>} : memref<8x32xf32, #tpu.memory_space<vmem>>, vector<8x32xf32>,
    } else {
    }
    %c0 = arith.constant 0 : index
    %c0_1 = arith.constant 0 : index
    %3 = vector.load %arg11[%c0, %c0_1] : memref<8x32xf32, #tpu.memory_space<vmem>>, vector<8x32xf32>
    %c0_2 = arith.constant 0 : index
    %c0_3 = arith.constant 0 : index
    %4 = vector.load %arg9[%c0_2, %c0_3] : memref<8x1xi32, #tpu.memory_space<vmem>>, vector<8x1xi32>
    %c0_4 = arith.constant 0 : index
    %c0_5 = arith.constant 0 : index
    %5 = vector.load %arg5[%c0_4, %c0_5] : memref<32x32xbf16, #tpu.memory_space<vmem>>, vector<32x32xbf16>
    %c0_6 = arith.constant 0 : index
    %c0_7 = arith.constant 0 : index
    %6 = vector.load %arg6[%c0_6, %c0_7] : memref<32x32xbf16, #tpu.memory_space<vmem>>, vector<32x32xbf16>
    %c0_8 = arith.constant 0 : index
    %c0_9 = arith.constant 0 : index
    %7 = vector.load %arg7[%c0_8, %c0_9] : memref<32x32xbf16, #tpu.memory_space<vmem>>, vector<32x32xbf16>
    %c0_10 = arith.constant 0 : index
    %c0_11 = arith.constant 0 : index
    %8 = vector.load %arg8[%c0_10, %c0_11] : memref<1x32xf32, #tpu.memory_space<vmem>>, vector<1x32xf32>
    %c8_i32 = arith.constant 8 : i32
    %9 = arith.muli %arg1, %c8_i32 : i32
    %10 = arith.truncf %3 : vector<8x32xf32> to vector<8x32xbf16>
    %cst = arith.constant dense<0.000000e+00> : vector<8x32xf32>
    %11 = tpu.matmul %10, %5, %cst {dimension_numbers = #tpu.dot_dimension_numbers<[1], [0], [0], [1], [0, 0, 1, 1], [], []>} : vector<8x32xbf16>, vector<32x32xbf16>, vector<8x32xf32> -> vector<8x32xf32>
    %cst_12 = arith.constant dense<0.000000e+00> : vector<8x32xf32>
    %12 = tpu.matmul %10, %6, %cst_12 {dimension_numbers = #tpu.dot_dimension_numbers<[1], [0], [0], [1], [0, 0, 1, 1], [], []>} : vector<8x32xbf16>, vector<32x32xbf16>, vector<8x32xf32> -> vector<8x32xf32>
    %cst_13 = arith.constant dense<0.000000e+00> : vector<8x32xf32>
    %13 = tpu.matmul %10, %7, %cst_13 {dimension_numbers = #tpu.dot_dimension_numbers<[1], [0], [0], [1], [0, 0, 1, 1], [], []>} : vector<8x32xbf16>, vector<32x32xbf16>, vector<8x32xf32> -> vector<8x32xf32>
    %c0_14 = arith.constant 0 : index
    %c0_15 = arith.constant 0 : index
    %c0_16 = arith.constant 0 : index
    %14 = vector.load %arg2[%c0_14, %c0_15, %c0_16] : memref<8x8x32xbf16, #tpu.memory_space<vmem>>, vector<1x8x32xbf16>
    %15 = vector.shape_cast %14 : vector<1x8x32xbf16> to vector<8x32xbf16>
    %16 = arith.extf %15 : vector<8x32xbf16> to vector<8x32xf32>
    %17 = arith.addf %16, %11 : vector<8x32xf32>
    %18 = arith.negf %17 : vector<8x32xf32>
    %19 = math.exp %18 : vector<8x32xf32>
    %cst_17 = arith.constant 1.000000e+00 : f32
    %20 = vector.broadcast %cst_17 : f32 to vector<8x32xf32>
    %21 = arith.addf %20, %19 : vector<8x32xf32>
    %22 = arith.divf %20, %21 : vector<8x32xf32>
    %c0_18 = arith.constant 0 : index
    %c0_19 = arith.constant 0 : index
    %c0_20 = arith.constant 0 : index
    %23 = vector.load %arg3[%c0_18, %c0_19, %c0_20] : memref<8x8x32xbf16, #tpu.memory_space<vmem>>, vector<1x8x32xbf16>
    %24 = vector.shape_cast %23 : vector<1x8x32xbf16> to vector<8x32xbf16>
    %25 = arith.extf %24 : vector<8x32xbf16> to vector<8x32xf32>
    %26 = arith.addf %25, %12 : vector<8x32xf32>
    %27 = arith.negf %26 : vector<8x32xf32>
    %28 = math.exp %27 : vector<8x32xf32>
    %cst_21 = arith.constant 1.000000e+00 : f32
    %29 = vector.broadcast %cst_21 : f32 to vector<8x32xf32>
    %30 = arith.addf %29, %28 : vector<8x32xf32>
    %31 = arith.divf %29, %30 : vector<8x32xf32>
    %c0_22 = arith.constant 0 : index
    %c0_23 = arith.constant 0 : index
    %c0_24 = arith.constant 0 : index
    %32 = vector.load %arg4[%c0_22, %c0_23, %c0_24] : memref<8x8x32xbf16, #tpu.memory_space<vmem>>, vector<1x8x32xbf16>
    %33 = vector.shape_cast %32 : vector<1x8x32xbf16> to vector<8x32xbf16>
    %34 = arith.extf %33 : vector<8x32xbf16> to vector<8x32xf32>
    %35 = vector.broadcast %8 : vector<1x32xf32> to vector<8x32xf32>
    %36 = arith.addf %13, %35 : vector<8x32xf32>
    %37 = arith.mulf %22, %36 : vector<8x32xf32>
    %38 = arith.addf %34, %37 : vector<8x32xf32>
    %39 = math.tanh %38 : vector<8x32xf32>
    %40 = arith.subf %3, %39 : vector<8x32xf32>
    %41 = arith.mulf %31, %40 : vector<8x32xf32>
    %42 = arith.addf %39, %41 : vector<8x32xf32>
    %c0_i32_25 = arith.constant 0 : i32
    %43 = arith.addi %9, %c0_i32_25 : i32
    %44 = vector.broadcast %43 : i32 to vector<8x1xi32>
    %45 = arith.cmpi slt, %44, %4 : vector<8x1xi32>
    %46 = vector.shape_cast %45 : vector<8x1xi1> to vector<8x1xi1>
    %47 = vector.broadcast %46 : vector<8x1xi1> to vector<8x32xi1>
    %48 = arith.select %47, %42, %3 : vector<8x32xi1>, vector<8x32xf32>
    %49 = arith.truncf %48 : vector<8x32xf32> to vector<8x32xbf16>
    %cst_26 = arith.constant dense<0.000000e+00> : vector<8x32xf32>
    %50 = tpu.matmul %49, %5, %cst_26 {dimension_numbers = #tpu.dot_dimension_numbers<[1], [0], [0], [1], [0, 0, 1, 1], [], []>} : vector<8x32xbf16>, vector<32x32xbf16>, vector<8x32xf32> -> vector<8x32xf32>
    %cst_27 = arith.constant dense<0.000000e+00> : vector<8x32xf32>
    %51 = tpu.matmul %49, %6, %cst_27 {dimension_numbers = #tpu.dot_dimension_numbers<[1], [0], [0], [1], [0, 0, 1, 1], [], []>} : vector<8x32xbf16>, vector<32x32xbf16>, vector<8x32xf32> -> vector<8x32xf32>
    %cst_28 = arith.constant dense<0.000000e+00> : vector<8x32xf32>
    %52 = tpu.matmul %49, %7, %cst_28 {dimension_numbers = #tpu.dot_dimension_numbers<[1], [0], [0], [1], [0, 0, 1, 1], [], []>} : vector<8x32xbf16>, vector<32x32xbf16>, vector<8x32xf32> -> vector<8x32xf32>
    %c1 = arith.constant 1 : index
    %c0_29 = arith.constant 0 : index
    %c0_30 = arith.constant 0 : index
    %53 = vector.load %arg2[%c1, %c0_29, %c0_30] : memref<8x8x32xbf16, #tpu.memory_space<vmem>>, vector<1x8x32xbf16>
    %54 = vector.shape_cast %53 : vector<1x8x32xbf16> to vector<8x32xbf16>
    %55 = arith.extf %54 : vector<8x32xbf16> to vector<8x32xf32>
    %56 = arith.addf %55, %50 : vector<8x32xf32>
    %57 = arith.negf %56 : vector<8x32xf32>
    %58 = math.exp %57 : vector<8x32xf32>
    %cst_31 = arith.constant 1.000000e+00 : f32
    %59 = vector.broadcast %cst_31 : f32 to vector<8x32xf32>
    %60 = arith.addf %59, %58 : vector<8x32xf32>
    %61 = arith.divf %59, %60 : vector<8x32xf32>
    %c1_32 = arith.constant 1 : index
    %c0_33 = arith.constant 0 : index
    %c0_34 = arith.constant 0 : index
    %62 = vector.load %arg3[%c1_32, %c0_33, %c0_34] : memref<8x8x32xbf16, #tpu.memory_space<vmem>>, vector<1x8x32xbf16>
    %63 = vector.shape_cast %62 : vector<1x8x32xbf16> to vector<8x32xbf16>
    %64 = arith.extf %63 : vector<8x32xbf16> to vector<8x32xf32>
    %65 = arith.addf %64, %51 : vector<8x32xf32>
    %66 = arith.negf %65 : vector<8x32xf32>
    %67 = math.exp %66 : vector<8x32xf32>
    %cst_35 = arith.constant 1.000000e+00 : f32
    %68 = vector.broadcast %cst_35 : f32 to vector<8x32xf32>
    %69 = arith.addf %68, %67 : vector<8x32xf32>
    %70 = arith.divf %68, %69 : vector<8x32xf32>
    %c1_36 = arith.constant 1 : index
    %c0_37 = arith.constant 0 : index
    %c0_38 = arith.constant 0 : index
    %71 = vector.load %arg4[%c1_36, %c0_37, %c0_38] : memref<8x8x32xbf16, #tpu.memory_space<vmem>>, vector<1x8x32xbf16>
    %72 = vector.shape_cast %71 : vector<1x8x32xbf16> to vector<8x32xbf16>
    %73 = arith.extf %72 : vector<8x32xbf16> to vector<8x32xf32>
    %74 = vector.broadcast %8 : vector<1x32xf32> to vector<8x32xf32>
    %75 = arith.addf %52, %74 : vector<8x32xf32>
    %76 = arith.mulf %61, %75 : vector<8x32xf32>
    %77 = arith.addf %73, %76 : vector<8x32xf32>
    %78 = math.tanh %77 : vector<8x32xf32>
    %79 = arith.subf %48, %78 : vector<8x32xf32>
    %80 = arith.mulf %70, %79 : vector<8x32xf32>
    %81 = arith.addf %78, %80 : vector<8x32xf32>
    %c1_i32 = arith.constant 1 : i32
    %82 = arith.addi %9, %c1_i32 : i32
    %83 = vector.broadcast %82 : i32 to vector<8x1xi32>
    %84 = arith.cmpi slt, %83, %4 : vector<8x1xi32>
    %85 = vector.shape_cast %84 : vector<8x1xi1> to vector<8x1xi1>
    %86 = vector.broadcast %85 : vector<8x1xi1> to vector<8x32xi1>
    %87 = arith.select %86, %81, %48 : vector<8x32xi1>, vector<8x32xf32>
    %88 = arith.truncf %87 : vector<8x32xf32> to vector<8x32xbf16>
    %cst_39 = arith.constant dense<0.000000e+00> : vector<8x32xf32>
    %89 = tpu.matmul %88, %5, %cst_39 {dimension_numbers = #tpu.dot_dimension_numbers<[1], [0], [0], [1], [0, 0, 1, 1], [], []>} : vector<8x32xbf16>, vector<32x32xbf16>, vector<8x32xf32> -> vector<8x32xf32>
    %cst_40 = arith.constant dense<0.000000e+00> : vector<8x32xf32>
    %90 = tpu.matmul %88, %6, %cst_40 {dimension_numbers = #tpu.dot_dimension_numbers<[1], [0], [0], [1], [0, 0, 1, 1], [], []>} : vector<8x32xbf16>, vector<32x32xbf16>, vector<8x32xf32> -> vector<8x32xf32>
    %cst_41 = arith.constant dense<0.000000e+00> : vector<8x32xf32>
    %91 = tpu.matmul %88, %7, %cst_41 {dimension_numbers = #tpu.dot_dimension_numbers<[1], [0], [0], [1], [0, 0, 1, 1], [], []>} : vector<8x32xbf16>, vector<32x32xbf16>, vector<8x32xf32> -> vector<8x32xf32>
    %c2 = arith.constant 2 : index
    %c0_42 = arith.constant 0 : index
    %c0_43 = arith.constant 0 : index
    %92 = vector.load %arg2[%c2, %c0_42, %c0_43] : memref<8x8x32xbf16, #tpu.memory_space<vmem>>, vector<1x8x32xbf16>
    %93 = vector.shape_cast %92 : vector<1x8x32xbf16> to vector<8x32xbf16>
    %94 = arith.extf %93 : vector<8x32xbf16> to vector<8x32xf32>
    %95 = arith.addf %94, %89 : vector<8x32xf32>
    %96 = arith.negf %95 : vector<8x32xf32>
    %97 = math.exp %96 : vector<8x32xf32>
    %cst_44 = arith.constant 1.000000e+00 : f32
    %98 = vector.broadcast %cst_44 : f32 to vector<8x32xf32>
    %99 = arith.addf %98, %97 : vector<8x32xf32>
    %100 = arith.divf %98, %99 : vector<8x32xf32>
    %c2_45 = arith.constant 2 : index
    %c0_46 = arith.constant 0 : index
    %c0_47 = arith.constant 0 : index
    %101 = vector.load %arg3[%c2_45, %c0_46, %c0_47] : memref<8x8x32xbf16, #tpu.memory_space<vmem>>, vector<1x8x32xbf16>
    %102 = vector.shape_cast %101 : vector<1x8x32xbf16> to vector<8x32xbf16>
    %103 = arith.extf %102 : vector<8x32xbf16> to vector<8x32xf32>
    %104 = arith.addf %103, %90 : vector<8x32xf32>
    %105 = arith.negf %104 : vector<8x32xf32>
    %106 = math.exp %105 : vector<8x32xf32>
    %cst_48 = arith.constant 1.000000e+00 : f32
    %107 = vector.broadcast %cst_48 : f32 to vector<8x32xf32>
    %108 = arith.addf %107, %106 : vector<8x32xf32>
    %109 = arith.divf %107, %108 : vector<8x32xf32>
    %c2_49 = arith.constant 2 : index
    %c0_50 = arith.constant 0 : index
    %c0_51 = arith.constant 0 : index
    %110 = vector.load %arg4[%c2_49, %c0_50, %c0_51] : memref<8x8x32xbf16, #tpu.memory_space<vmem>>, vector<1x8x32xbf16>
    %111 = vector.shape_cast %110 : vector<1x8x32xbf16> to vector<8x32xbf16>
    %112 = arith.extf %111 : vector<8x32xbf16> to vector<8x32xf32>
    %113 = vector.broadcast %8 : vector<1x32xf32> to vector<8x32xf32>
    %114 = arith.addf %91, %113 : vector<8x32xf32>
    %115 = arith.mulf %100, %114 : vector<8x32xf32>
    %116 = arith.addf %112, %115 : vector<8x32xf32>
    %117 = math.tanh %116 : vector<8x32xf32>
    %118 = arith.subf %87, %117 : vector<8x32xf32>
    %119 = arith.mulf %109, %118 : vector<8x32xf32>
    %120 = arith.addf %117, %119 : vector<8x32xf32>
    %c2_i32 = arith.constant 2 : i32
    %121 = arith.addi %9, %c2_i32 : i32
    %122 = vector.broadcast %121 : i32 to vector<8x1xi32>
    %123 = arith.cmpi slt, %122, %4 : vector<8x1xi32>
    %124 = vector.shape_cast %123 : vector<8x1xi1> to vector<8x1xi1>
    %125 = vector.broadcast %124 : vector<8x1xi1> to vector<8x32xi1>
    %126 = arith.select %125, %120, %87 : vector<8x32xi1>, vector<8x32xf32>
    %127 = arith.truncf %126 : vector<8x32xf32> to vector<8x32xbf16>
    %cst_52 = arith.constant dense<0.000000e+00> : vector<8x32xf32>
    %128 = tpu.matmul %127, %5, %cst_52 {dimension_numbers = #tpu.dot_dimension_numbers<[1], [0], [0], [1], [0, 0, 1, 1], [], []>} : vector<8x32xbf16>, vector<32x32xbf16>, vector<8x32xf32> -> vector<8x32xf32>
    %cst_53 = arith.constant dense<0.000000e+00> : vector<8x32xf32>
    %129 = tpu.matmul %127, %6, %cst_53 {dimension_numbers = #tpu.dot_dimension_numbers<[1], [0], [0], [1], [0, 0, 1, 1], [], []>} : vector<8x32xbf16>, vector<32x32xbf16>, vector<8x32xf32> -> vector<8x32xf32>
    %cst_54 = arith.constant dense<0.000000e+00> : vector<8x32xf32>
    %130 = tpu.matmul %127, %7, %cst_54 {dimension_numbers = #tpu.dot_dimension_numbers<[1], [0], [0], [1], [0, 0, 1, 1], [], []>} : vector<8x32xbf16>, vector<32x32xbf16>, vector<8x32xf32> -> vector<8x32xf32>
    %c3 = arith.constant 3 : index
    %c0_55 = arith.constant 0 : index
    %c0_56 = arith.constant 0 : index
    %131 = vector.load %arg2[%c3, %c0_55, %c0_56] : memref<8x8x32xbf16, #tpu.memory_space<vmem>>, vector<1x8x32xbf16>
    %132 = vector.shape_cast %131 : vector<1x8x32xbf16> to vector<8x32xbf16>
    %133 = arith.extf %132 : vector<8x32xbf16> to vector<8x32xf32>
    %134 = arith.addf %133, %128 : vector<8x32xf32>
    %135 = arith.negf %134 : vector<8x32xf32>
    %136 = math.exp %135 : vector<8x32xf32>
    %cst_57 = arith.constant 1.000000e+00 : f32
    %137 = vector.broadcast %cst_57 : f32 to vector<8x32xf32>
    %138 = arith.addf %137, %136 : vector<8x32xf32>
    %139 = arith.divf %137, %138 : vector<8x32xf32>
    %c3_58 = arith.constant 3 : index
    %c0_59 = arith.constant 0 : index
    %c0_60 = arith.constant 0 : index
    %140 = vector.load %arg3[%c3_58, %c0_59, %c0_60] : memref<8x8x32xbf16, #tpu.memory_space<vmem>>, vector<1x8x32xbf16>
    %141 = vector.shape_cast %140 : vector<1x8x32xbf16> to vector<8x32xbf16>
    %142 = arith.extf %141 : vector<8x32xbf16> to vector<8x32xf32>
    %143 = arith.addf %142, %129 : vector<8x32xf32>
    %144 = arith.negf %143 : vector<8x32xf32>
    %145 = math.exp %144 : vector<8x32xf32>
    %cst_61 = arith.constant 1.000000e+00 : f32
    %146 = vector.broadcast %cst_61 : f32 to vector<8x32xf32>
    %147 = arith.addf %146, %145 : vector<8x32xf32>
    %148 = arith.divf %146, %147 : vector<8x32xf32>
    %c3_62 = arith.constant 3 : index
    %c0_63 = arith.constant 0 : index
    %c0_64 = arith.constant 0 : index
    %149 = vector.load %arg4[%c3_62, %c0_63, %c0_64] : memref<8x8x32xbf16, #tpu.memory_space<vmem>>, vector<1x8x32xbf16>
    %150 = vector.shape_cast %149 : vector<1x8x32xbf16> to vector<8x32xbf16>
    %151 = arith.extf %150 : vector<8x32xbf16> to vector<8x32xf32>
    %152 = vector.broadcast %8 : vector<1x32xf32> to vector<8x32xf32>
    %153 = arith.addf %130, %152 : vector<8x32xf32>
    %154 = arith.mulf %139, %153 : vector<8x32xf32>
    %155 = arith.addf %151, %154 : vector<8x32xf32>
    %156 = math.tanh %155 : vector<8x32xf32>
    %157 = arith.subf %126, %156 : vector<8x32xf32>
    %158 = arith.mulf %148, %157 : vector<8x32xf32>
    %159 = arith.addf %156, %158 : vector<8x32xf32>
    %c3_i32 = arith.constant 3 : i32
    %160 = arith.addi %9, %c3_i32 : i32
    %161 = vector.broadcast %160 : i32 to vector<8x1xi32>
    %162 = arith.cmpi slt, %161, %4 : vector<8x1xi32>
    %163 = vector.shape_cast %162 : vector<8x1xi1> to vector<8x1xi1>
    %164 = vector.broadcast %163 : vector<8x1xi1> to vector<8x32xi1>
    %165 = arith.select %164, %159, %126 : vector<8x32xi1>, vector<8x32xf32>
    %166 = arith.truncf %165 : vector<8x32xf32> to vector<8x32xbf16>
    %cst_65 = arith.constant dense<0.000000e+00> : vector<8x32xf32>
    %167 = tpu.matmul %166, %5, %cst_65 {dimension_numbers = #tpu.dot_dimension_numbers<[1], [0], [0], [1], [0, 0, 1, 1], [], []>} : vector<8x32xbf16>, vector<32x32xbf16>, vector<8x32xf32> -> vector<8x32xf32>
    %cst_66 = arith.constant dense<0.000000e+00> : vector<8x32xf32>
    %168 = tpu.matmul %166, %6, %cst_66 {dimension_numbers = #tpu.dot_dimension_numbers<[1], [0], [0], [1], [0, 0, 1, 1], [], []>} : vector<8x32xbf16>, vector<32x32xbf16>, vector<8x32xf32> -> vector<8x32xf32>
    %cst_67 = arith.constant dense<0.000000e+00> : vector<8x32xf32>
    %169 = tpu.matmul %166, %7, %cst_67 {dimension_numbers = #tpu.dot_dimension_numbers<[1], [0], [0], [1], [0, 0, 1, 1], [], []>} : vector<8x32xbf16>, vector<32x32xbf16>, vector<8x32xf32> -> vector<8x32xf32>
    %c4 = arith.constant 4 : index
    %c0_68 = arith.constant 0 : index
    %c0_69 = arith.constant 0 : index
    %170 = vector.load %arg2[%c4, %c0_68, %c0_69] : memref<8x8x32xbf16, #tpu.memory_space<vmem>>, vector<1x8x32xbf16>
    %171 = vector.shape_cast %170 : vector<1x8x32xbf16> to vector<8x32xbf16>
    %172 = arith.extf %171 : vector<8x32xbf16> to vector<8x32xf32>
    %173 = arith.addf %172, %167 : vector<8x32xf32>
    %174 = arith.negf %173 : vector<8x32xf32>
    %175 = math.exp %174 : vector<8x32xf32>
    %cst_70 = arith.constant 1.000000e+00 : f32
    %176 = vector.broadcast %cst_70 : f32 to vector<8x32xf32>
    %177 = arith.addf %176, %175 : vector<8x32xf32>
    %178 = arith.divf %176, %177 : vector<8x32xf32>
    %c4_71 = arith.constant 4 : index
    %c0_72 = arith.constant 0 : index
    %c0_73 = arith.constant 0 : index
    %179 = vector.load %arg3[%c4_71, %c0_72, %c0_73] : memref<8x8x32xbf16, #tpu.memory_space<vmem>>, vector<1x8x32xbf16>
    %180 = vector.shape_cast %179 : vector<1x8x32xbf16> to vector<8x32xbf16>
    %181 = arith.extf %180 : vector<8x32xbf16> to vector<8x32xf32>
    %182 = arith.addf %181, %168 : vector<8x32xf32>
    %183 = arith.negf %182 : vector<8x32xf32>
    %184 = math.exp %183 : vector<8x32xf32>
    %cst_74 = arith.constant 1.000000e+00 : f32
    %185 = vector.broadcast %cst_74 : f32 to vector<8x32xf32>
    %186 = arith.addf %185, %184 : vector<8x32xf32>
    %187 = arith.divf %185, %186 : vector<8x32xf32>
    %c4_75 = arith.constant 4 : index
    %c0_76 = arith.constant 0 : index
    %c0_77 = arith.constant 0 : index
    %188 = vector.load %arg4[%c4_75, %c0_76, %c0_77] : memref<8x8x32xbf16, #tpu.memory_space<vmem>>, vector<1x8x32xbf16>
    %189 = vector.shape_cast %188 : vector<1x8x32xbf16> to vector<8x32xbf16>
    %190 = arith.extf %189 : vector<8x32xbf16> to vector<8x32xf32>
    %191 = vector.broadcast %8 : vector<1x32xf32> to vector<8x32xf32>
    %192 = arith.addf %169, %191 : vector<8x32xf32>
    %193 = arith.mulf %178, %192 : vector<8x32xf32>
    %194 = arith.addf %190, %193 : vector<8x32xf32>
    %195 = math.tanh %194 : vector<8x32xf32>
    %196 = arith.subf %165, %195 : vector<8x32xf32>
    %197 = arith.mulf %187, %196 : vector<8x32xf32>
    %198 = arith.addf %195, %197 : vector<8x32xf32>
    %c4_i32 = arith.constant 4 : i32
    %199 = arith.addi %9, %c4_i32 : i32
    %200 = vector.broadcast %199 : i32 to vector<8x1xi32>
    %201 = arith.cmpi slt, %200, %4 : vector<8x1xi32>
    %202 = vector.shape_cast %201 : vector<8x1xi1> to vector<8x1xi1>
    %203 = vector.broadcast %202 : vector<8x1xi1> to vector<8x32xi1>
    %204 = arith.select %203, %198, %165 : vector<8x32xi1>, vector<8x32xf32>
    %205 = arith.truncf %204 : vector<8x32xf32> to vector<8x32xbf16>
    %cst_78 = arith.constant dense<0.000000e+00> : vector<8x32xf32>
    %206 = tpu.matmul %205, %5, %cst_78 {dimension_numbers = #tpu.dot_dimension_numbers<[1], [0], [0], [1], [0, 0, 1, 1], [], []>} : vector<8x32xbf16>, vector<32x32xbf16>, vector<8x32xf32> -> vector<8x32xf32>
    %cst_79 = arith.constant dense<0.000000e+00> : vector<8x32xf32>
    %207 = tpu.matmul %205, %6, %cst_79 {dimension_numbers = #tpu.dot_dimension_numbers<[1], [0], [0], [1], [0, 0, 1, 1], [], []>} : vector<8x32xbf16>, vector<32x32xbf16>, vector<8x32xf32> -> vector<8x32xf32>
    %cst_80 = arith.constant dense<0.000000e+00> : vector<8x32xf32>
    %208 = tpu.matmul %205, %7, %cst_80 {dimension_numbers = #tpu.dot_dimension_numbers<[1], [0], [0], [1], [0, 0, 1, 1], [], []>} : vector<8x32xbf16>, vector<32x32xbf16>, vector<8x32xf32> -> vector<8x32xf32>
    %c5 = arith.constant 5 : index
    %c0_81 = arith.constant 0 : index
    %c0_82 = arith.constant 0 : index
    %209 = vector.load %arg2[%c5, %c0_81, %c0_82] : memref<8x8x32xbf16, #tpu.memory_space<vmem>>, vector<1x8x32xbf16>
    %210 = vector.shape_cast %209 : vector<1x8x32xbf16> to vector<8x32xbf16>
    %211 = arith.extf %210 : vector<8x32xbf16> to vector<8x32xf32>
    %212 = arith.addf %211, %206 : vector<8x32xf32>
    %213 = arith.negf %212 : vector<8x32xf32>
    %214 = math.exp %213 : vector<8x32xf32>
    %cst_83 = arith.constant 1.000000e+00 : f32
    %215 = vector.broadcast %cst_83 : f32 to vector<8x32xf32>
    %216 = arith.addf %215, %214 : vector<8x32xf32>
    %217 = arith.divf %215, %216 : vector<8x32xf32>
    %c5_84 = arith.constant 5 : index
    %c0_85 = arith.constant 0 : index
    %c0_86 = arith.constant 0 : index
    %218 = vector.load %arg3[%c5_84, %c0_85, %c0_86] : memref<8x8x32xbf16, #tpu.memory_space<vmem>>, vector<1x8x32xbf16>
    %219 = vector.shape_cast %218 : vector<1x8x32xbf16> to vector<8x32xbf16>
    %220 = arith.extf %219 : vector<8x32xbf16> to vector<8x32xf32>
    %221 = arith.addf %220, %207 : vector<8x32xf32>
    %222 = arith.negf %221 : vector<8x32xf32>
    %223 = math.exp %222 : vector<8x32xf32>
    %cst_87 = arith.constant 1.000000e+00 : f32
    %224 = vector.broadcast %cst_87 : f32 to vector<8x32xf32>
    %225 = arith.addf %224, %223 : vector<8x32xf32>
    %226 = arith.divf %224, %225 : vector<8x32xf32>
    %c5_88 = arith.constant 5 : index
    %c0_89 = arith.constant 0 : index
    %c0_90 = arith.constant 0 : index
    %227 = vector.load %arg4[%c5_88, %c0_89, %c0_90] : memref<8x8x32xbf16, #tpu.memory_space<vmem>>, vector<1x8x32xbf16>
    %228 = vector.shape_cast %227 : vector<1x8x32xbf16> to vector<8x32xbf16>
    %229 = arith.extf %228 : vector<8x32xbf16> to vector<8x32xf32>
    %230 = vector.broadcast %8 : vector<1x32xf32> to vector<8x32xf32>
    %231 = arith.addf %208, %230 : vector<8x32xf32>
    %232 = arith.mulf %217, %231 : vector<8x32xf32>
    %233 = arith.addf %229, %232 : vector<8x32xf32>
    %234 = math.tanh %233 : vector<8x32xf32>
    %235 = arith.subf %204, %234 : vector<8x32xf32>
    %236 = arith.mulf %226, %235 : vector<8x32xf32>
    %237 = arith.addf %234, %236 : vector<8x32xf32>
    %c5_i32 = arith.constant 5 : i32
    %238 = arith.addi %9, %c5_i32 : i32
    %239 = vector.broadcast %238 : i32 to vector<8x1xi32>
    %240 = arith.cmpi slt, %239, %4 : vector<8x1xi32>
    %241 = vector.shape_cast %240 : vector<8x1xi1> to vector<8x1xi1>
    %242 = vector.broadcast %241 : vector<8x1xi1> to vector<8x32xi1>
    %243 = arith.select %242, %237, %204 : vector<8x32xi1>, vector<8x32xf32>
    %244 = arith.truncf %243 : vector<8x32xf32> to vector<8x32xbf16>
    %cst_91 = arith.constant dense<0.000000e+00> : vector<8x32xf32>
    %245 = tpu.matmul %244, %5, %cst_91 {dimension_numbers = #tpu.dot_dimension_numbers<[1], [0], [0], [1], [0, 0, 1, 1], [], []>} : vector<8x32xbf16>, vector<32x32xbf16>, vector<8x32xf32> -> vector<8x32xf32>
    %cst_92 = arith.constant dense<0.000000e+00> : vector<8x32xf32>
    %246 = tpu.matmul %244, %6, %cst_92 {dimension_numbers = #tpu.dot_dimension_numbers<[1], [0], [0], [1], [0, 0, 1, 1], [], []>} : vector<8x32xbf16>, vector<32x32xbf16>, vector<8x32xf32> -> vector<8x32xf32>
    %cst_93 = arith.constant dense<0.000000e+00> : vector<8x32xf32>
    %247 = tpu.matmul %244, %7, %cst_93 {dimension_numbers = #tpu.dot_dimension_numbers<[1], [0], [0], [1], [0, 0, 1, 1], [], []>} : vector<8x32xbf16>, vector<32x32xbf16>, vector<8x32xf32> -> vector<8x32xf32>
    %c6 = arith.constant 6 : index
    %c0_94 = arith.constant 0 : index
    %c0_95 = arith.constant 0 : index
    %248 = vector.load %arg2[%c6, %c0_94, %c0_95] : memref<8x8x32xbf16, #tpu.memory_space<vmem>>, vector<1x8x32xbf16>
    %249 = vector.shape_cast %248 : vector<1x8x32xbf16> to vector<8x32xbf16>
    %250 = arith.extf %249 : vector<8x32xbf16> to vector<8x32xf32>
    %251 = arith.addf %250, %245 : vector<8x32xf32>
    %252 = arith.negf %251 : vector<8x32xf32>
    %253 = math.exp %252 : vector<8x32xf32>
    %cst_96 = arith.constant 1.000000e+00 : f32
    %254 = vector.broadcast %cst_96 : f32 to vector<8x32xf32>
    %255 = arith.addf %254, %253 : vector<8x32xf32>
    %256 = arith.divf %254, %255 : vector<8x32xf32>
    %c6_97 = arith.constant 6 : index
    %c0_98 = arith.constant 0 : index
    %c0_99 = arith.constant 0 : index
    %257 = vector.load %arg3[%c6_97, %c0_98, %c0_99] : memref<8x8x32xbf16, #tpu.memory_space<vmem>>, vector<1x8x32xbf16>
    %258 = vector.shape_cast %257 : vector<1x8x32xbf16> to vector<8x32xbf16>
    %259 = arith.extf %258 : vector<8x32xbf16> to vector<8x32xf32>
    %260 = arith.addf %259, %246 : vector<8x32xf32>
    %261 = arith.negf %260 : vector<8x32xf32>
    %262 = math.exp %261 : vector<8x32xf32>
    %cst_100 = arith.constant 1.000000e+00 : f32
    %263 = vector.broadcast %cst_100 : f32 to vector<8x32xf32>
    %264 = arith.addf %263, %262 : vector<8x32xf32>
    %265 = arith.divf %263, %264 : vector<8x32xf32>
    %c6_101 = arith.constant 6 : index
    %c0_102 = arith.constant 0 : index
    %c0_103 = arith.constant 0 : index
    %266 = vector.load %arg4[%c6_101, %c0_102, %c0_103] : memref<8x8x32xbf16, #tpu.memory_space<vmem>>, vector<1x8x32xbf16>
    %267 = vector.shape_cast %266 : vector<1x8x32xbf16> to vector<8x32xbf16>
    %268 = arith.extf %267 : vector<8x32xbf16> to vector<8x32xf32>
    %269 = vector.broadcast %8 : vector<1x32xf32> to vector<8x32xf32>
    %270 = arith.addf %247, %269 : vector<8x32xf32>
    %271 = arith.mulf %256, %270 : vector<8x32xf32>
    %272 = arith.addf %268, %271 : vector<8x32xf32>
    %273 = math.tanh %272 : vector<8x32xf32>
    %274 = arith.subf %243, %273 : vector<8x32xf32>
    %275 = arith.mulf %265, %274 : vector<8x32xf32>
    %276 = arith.addf %273, %275 : vector<8x32xf32>
    %c6_i32 = arith.constant 6 : i32
    %277 = arith.addi %9, %c6_i32 : i32
    %278 = vector.broadcast %277 : i32 to vector<8x1xi32>
    %279 = arith.cmpi slt, %278, %4 : vector<8x1xi32>
    %280 = vector.shape_cast %279 : vector<8x1xi1> to vector<8x1xi1>
    %281 = vector.broadcast %280 : vector<8x1xi1> to vector<8x32xi1>
    %282 = arith.select %281, %276, %243 : vector<8x32xi1>, vector<8x32xf32>
    %283 = arith.truncf %282 : vector<8x32xf32> to vector<8x32xbf16>
    %cst_104 = arith.constant dense<0.000000e+00> : vector<8x32xf32>
    %284 = tpu.matmul %283, %5, %cst_104 {dimension_numbers = #tpu.dot_dimension_numbers<[1], [0], [0], [1], [0, 0, 1, 1], [], []>} : vector<8x32xbf16>, vector<32x32xbf16>, vector<8x32xf32> -> vector<8x32xf32>
    %cst_105 = arith.constant dense<0.000000e+00> : vector<8x32xf32>
    %285 = tpu.matmul %283, %6, %cst_105 {dimension_numbers = #tpu.dot_dimension_numbers<[1], [0], [0], [1], [0, 0, 1, 1], [], []>} : vector<8x32xbf16>, vector<32x32xbf16>, vector<8x32xf32> -> vector<8x32xf32>
    %cst_106 = arith.constant dense<0.000000e+00> : vector<8x32xf32>
    %286 = tpu.matmul %283, %7, %cst_106 {dimension_numbers = #tpu.dot_dimension_numbers<[1], [0], [0], [1], [0, 0, 1, 1], [], []>} : vector<8x32xbf16>, vector<32x32xbf16>, vector<8x32xf32> -> vector<8x32xf32>
    %c7 = arith.constant 7 : index
    %c0_107 = arith.constant 0 : index
    %c0_108 = arith.constant 0 : index
    %287 = vector.load %arg2[%c7, %c0_107, %c0_108] : memref<8x8x32xbf16, #tpu.memory_space<vmem>>, vector<1x8x32xbf16>
    %288 = vector.shape_cast %287 : vector<1x8x32xbf16> to vector<8x32xbf16>
    %289 = arith.extf %288 : vector<8x32xbf16> to vector<8x32xf32>
    %290 = arith.addf %289, %284 : vector<8x32xf32>
    %291 = arith.negf %290 : vector<8x32xf32>
    %292 = math.exp %291 : vector<8x32xf32>
    %cst_109 = arith.constant 1.000000e+00 : f32
    %293 = vector.broadcast %cst_109 : f32 to vector<8x32xf32>
    %294 = arith.addf %293, %292 : vector<8x32xf32>
    %295 = arith.divf %293, %294 : vector<8x32xf32>
    %c7_110 = arith.constant 7 : index
    %c0_111 = arith.constant 0 : index
    %c0_112 = arith.constant 0 : index
    %296 = vector.load %arg3[%c7_110, %c0_111, %c0_112] : memref<8x8x32xbf16, #tpu.memory_space<vmem>>, vector<1x8x32xbf16>
    %297 = vector.shape_cast %296 : vector<1x8x32xbf16> to vector<8x32xbf16>
    %298 = arith.extf %297 : vector<8x32xbf16> to vector<8x32xf32>
    %299 = arith.addf %298, %285 : vector<8x32xf32>
    %300 = arith.negf %299 : vector<8x32xf32>
    %301 = math.exp %300 : vector<8x32xf32>
    %cst_113 = arith.constant 1.000000e+00 : f32
    %302 = vector.broadcast %cst_113 : f32 to vector<8x32xf32>
    %303 = arith.addf %302, %301 : vector<8x32xf32>
    %304 = arith.divf %302, %303 : vector<8x32xf32>
    %c7_114 = arith.constant 7 : index
    %c0_115 = arith.constant 0 : index
    %c0_116 = arith.constant 0 : index
    %305 = vector.load %arg4[%c7_114, %c0_115, %c0_116] : memref<8x8x32xbf16, #tpu.memory_space<vmem>>, vector<1x8x32xbf16>
    %306 = vector.shape_cast %305 : vector<1x8x32xbf16> to vector<8x32xbf16>
    %307 = arith.extf %306 : vector<8x32xbf16> to vector<8x32xf32>
    %308 = vector.broadcast %8 : vector<1x32xf32> to vector<8x32xf32>
    %309 = arith.addf %286, %308 : vector<8x32xf32>
    %310 = arith.mulf %295, %309 : vector<8x32xf32>
    %311 = arith.addf %307, %310 : vector<8x32xf32>
    %312 = math.tanh %311 : vector<8x32xf32>
    %313 = arith.subf %282, %312 : vector<8x32xf32>
    %314 = arith.mulf %304, %313 : vector<8x32xf32>
    %315 = arith.addf %312, %314 : vector<8x32xf32>
    %c7_i32 = arith.constant 7 : i32
    %316 = arith.addi %9, %c7_i32 : i32
    %317 = vector.broadcast %316 : i32 to vector<8x1xi32>
    %318 = arith.cmpi slt, %317, %4 : vector<8x1xi32>
    %319 = vector.shape_cast %318 : vector<8x1xi1> to vector<8x1xi1>
    %320 = vector.broadcast %319 : vector<8x1xi1> to vector<8x32xi1>
    %321 = arith.select %320, %315, %282 : vector<8x32xi1>, vector<8x32xf32>
    %c0_117 = arith.constant 0 : index
    %c0_118 = arith.constant 0 : index
    %322 = vector.load %arg11[%c0_117, %c0_118] : memref<8x32xf32, #tpu.memory_space<vmem>>, vector<8x32xf32>
    tpu.vector_store %arg11[%c0_117, %c0_118], %321 {strides = array<i32>} : memref<8x32xf32, #tpu.memory_space<vmem>>, vector<8x32xf32>,
    %c0_i32_119 = arith.constant 0 : i32
    %323 = arith.cmpi eq, %arg1, %c0_i32_119 : i32
    %324 = arith.extui %323 : i1 to i32
    %c0_i32_120 = arith.constant 0 : i32
    %325 = arith.cmpi ne, %324, %c0_i32_120 : i32
    scf.if %325 {
      %326 = arith.mulf %321, %321 : vector<8x32xf32>
      %cst_121 = arith.constant dense<0.000000e+00> : vector<8xf32>
      %327 = vector.multi_reduction <add>, %326, %cst_121 [1] : vector<8x32xf32> to vector<8xf32>
      %328 = vector.shape_cast %327 : vector<8xf32> to vector<8x1xf32>
      %cst_122 = arith.constant 9.99999996E-13 : f32
      %329 = vector.broadcast %cst_122 : f32 to vector<8x1xf32>
      %330 = arith.addf %328, %329 : vector<8x1xf32>
      %331 = math.rsqrt %330 : vector<8x1xf32>
      %332 = vector.broadcast %331 : vector<8x1xf32> to vector<8x32xf32>
      %333 = arith.mulf %321, %332 : vector<8x32xf32>
      %c0_123 = arith.constant 0 : index
      %c0_124 = arith.constant 0 : index
      %334 = vector.load %arg10[%c0_123, %c0_124] : memref<8x32xf32, #tpu.memory_space<vmem>>, vector<8x32xf32>
      tpu.vector_store %arg10[%c0_123, %c0_124], %333 {strides = array<i32>} : memref<8x32xf32, #tpu.memory_space<vmem>>, vector<8x32xf32>,
    } else {
    }
    return
  }
  func.func @transform_0(%arg0: i32, %arg1: i32) -> (i32, i32, i32) {
    %c0_i32 = arith.constant 0 : i32
    %c0_i32_0 = arith.constant 0 : i32
    return %arg1, %arg0, %c0_i32 : i32, i32, i32
  }
  func.func @transform_1(%arg0: i32, %arg1: i32) -> (i32, i32, i32) {
    %c0_i32 = arith.constant 0 : i32
    %c0_i32_0 = arith.constant 0 : i32
    return %arg1, %arg0, %c0_i32 : i32, i32, i32
  }
  func.func @transform_2(%arg0: i32, %arg1: i32) -> (i32, i32, i32) {
    %c0_i32 = arith.constant 0 : i32
    %c0_i32_0 = arith.constant 0 : i32
    return %arg1, %arg0, %c0_i32 : i32, i32, i32
  }
  func.func @transform_3(%arg0: i32, %arg1: i32) -> (i32, i32) {
    %c0_i32 = arith.constant 0 : i32
    %c0_i32_0 = arith.constant 0 : i32
    %c0_i32_1 = arith.constant 0 : i32
    return %c0_i32, %c0_i32_0 : i32, i32
  }
  func.func @transform_4(%arg0: i32, %arg1: i32) -> (i32, i32) {
    %c0_i32 = arith.constant 0 : i32
    %c0_i32_0 = arith.constant 0 : i32
    %c0_i32_1 = arith.constant 0 : i32
    return %c0_i32, %c0_i32_0 : i32, i32
  }
  func.func @transform_5(%arg0: i32, %arg1: i32) -> (i32, i32) {
    %c0_i32 = arith.constant 0 : i32
    %c0_i32_0 = arith.constant 0 : i32
    %c0_i32_1 = arith.constant 0 : i32
    return %c0_i32, %c0_i32_0 : i32, i32
  }
  func.func @transform_6(%arg0: i32, %arg1: i32) -> (i32, i32) {
    %c0_i32 = arith.constant 0 : i32
    %c0_i32_0 = arith.constant 0 : i32
    %c0_i32_1 = arith.constant 0 : i32
    return %c0_i32, %c0_i32_0 : i32, i32
  }
  func.func @transform_7(%arg0: i32, %arg1: i32) -> (i32, i32) {
    %c0_i32 = arith.constant 0 : i32
    %c0_i32_0 = arith.constant 0 : i32
    return %arg0, %c0_i32 : i32, i32
  }
  func.func @transform_8(%arg0: i32, %arg1: i32) -> (i32, i32) {
    %c0_i32 = arith.constant 0 : i32
    %c0_i32_0 = arith.constant 0 : i32
    return %arg0, %c0_i32 : i32, i32
  }
}

</mosaic_0001>

<bundles_post_ra>
// kernel: tpu_custom_call.1
= control target key start
LH: loop header
LB: loop body
LE: loop exit
PB: predicated region body
PF: predicated region fallthrough
CT: control target
= control target key end

     0   :  { %13 = vsyncpa [#allocation4], 0  ;;  %s2409_s0 = inlined_call_operand.hbm [shape: bf16[8,8,32], index: 0, kind: input, shape index: {}]   ;;  %s2410_s1 = inlined_call_operand.hbm [shape: bf16[8,8,32], index: 1, kind: input, shape index: {}]   ;;  %s2411_s2 = inlined_call_operand.hbm [shape: bf16[8,8,32], index: 2, kind: input, shape index: {}]   ;;  %s2412_s3 = inlined_call_operand.hbm [shape: bf16[32,32], index: 3, kind: input, shape index: {}]   ;;  %s2413_s4 = inlined_call_operand.vmem [shape: bf16[32,32], index: 4, kind: input, shape index: {}]   ;;  %s2414_s5 = inlined_call_operand.hbm [shape: bf16[32,32], index: 5, kind: input, shape index: {}]   ;;  %s2415_s6 = inlined_call_operand.vmem [shape: f32[1,32], index: 6, kind: input, shape index: {}]   ;;  %s2416_s7 = inlined_call_operand.vmem [shape: s32[8,1], index: 7, kind: input, shape index: {}]   ;;  %s2417_s8 = inlined_call_operand.hbm [shape: f32[8,32], index: 8, kind: output, shape index: {}]  }
   0x1   :  { %14 = vsyncpa [#allocation7], 0 }
   0x2   :  { %15 = vsyncpa [#allocation10], 0 }
   0x3   :  { %16 = vsyncpa [#allocation5], 0  ;;  %s2033_s27 = smov [#allocation6]   ;;  %s2034_s29 = smov [#allocation9]  }
   0x4   :  { %s34_s28 = sshll.u32 %s2033_s27, 4  ;;  %s58_s30 = sshll.u32 %s2034_s29, 4  ;;  %s35_s28 = int_to_ptr.vmem [resolvable:$true] %s34_s28  ;;  %s59_s30 = int_to_ptr.vmem [resolvable:$true] %s58_s30 }
   0x5   :  { %s1913_s9 = scalar_lea.vmem %s35_s28, 512  ;;  %p1918_p1 = scmp.lt.s32.totalorder %s35_s28, %s35_s28 }
   0x6   :  { %p1914_p0 = scmp.ne.s32.totalorder %s35_s28, %s1913_s9  ;;  %p1919_p2 = scmp.lt.s32.totalorder %s1913_s9, %s1913_s9 }
   0x8   :  { %p1920_p3 = por %p1919_p2, %p1918_p1 }
   0xa   :  { %p1921_p4 = pnand %p1920_p3, %p1914_p0 }
   0xc   :  { %1924 = shalt.err (!%p1921_p4)
}
   0xd   :  { %s2035_s10 = smov 64   ;;  %s2036_s11 = smov 4  }
   0xe   :  { %40 = dma.hbm_to_vmem [thread:$0]  %s2410_s1, 512, %s35_s28, [#allocation7], %s2035_s10, %s2035_s10, %s2036_s11  }
   0xf   :  { %s1933_s14 = scalar_lea.vmem %s59_s30, 256  ;;  %p1938_p6 = scmp.lt.s32.totalorder %s59_s30, %s59_s30 }
  0x10   :  { %p1934_p5 = scmp.ne.s32.totalorder %s59_s30, %s1933_s14  ;;  %p1939_p7 = scmp.lt.s32.totalorder %s1933_s14, %s1933_s14 }
  0x12   :  { %p1940_p8 = por %p1939_p7, %p1938_p6 }
  0x14   :  { %p1941_p9 = pnand %p1940_p8, %p1934_p5 }
  0x16   :  { %1944 = shalt.err (!%p1941_p9)
}
  0x17   :  { %64 = dma.hbm_to_vmem [thread:$0]  %s2412_s3, 256, %s59_s30, [#allocation10], %s2035_s10, %s2035_s10, %s2036_s11  }
  0x18   :  { %s2037_s17 = smov [#allocation3]   ;;  %s2038_s19 = smov [#allocation8]  }
  0x19   :  { %s22_s18 = sshll.u32 %s2037_s17, 4  ;;  %s46_s20 = sshll.u32 %s2038_s19, 4  ;;  %s23_s18 = int_to_ptr.vmem [resolvable:$true] %s22_s18  ;;  %s47_s20 = int_to_ptr.vmem [resolvable:$true] %s46_s20 }
  0x1a   :  { %s1953_s1 = scalar_lea.vmem %s23_s18, 512  ;;  %p1958_p11 = scmp.lt.s32.totalorder %s23_s18, %s23_s18 }
  0x1b   :  { %p1954_p10 = scmp.ne.s32.totalorder %s23_s18, %s1953_s1  ;;  %p1959_p12 = scmp.lt.s32.totalorder %s1953_s1, %s1953_s1 }
  0x1d   :  { %p1960_p13 = por %p1959_p12, %p1958_p11 }
  0x1f   :  { %p1961_p0 = pnand %p1960_p13, %p1954_p10 }
  0x21   :  { %1964 = shalt.err (!%p1961_p0)
}
  0x22   :  { %28 = dma.hbm_to_vmem [thread:$0]  %s2409_s0, 512, %s23_s18, [#allocation4], %s2035_s10, %s2035_s10, %s2036_s11  }
  0x23   :  { %s1973_s3 = scalar_lea.vmem %s47_s20, 512  ;;  %p1978_p2 = scmp.lt.s32.totalorder %s47_s20, %s47_s20 }
  0x24   :  { %p1974_p1 = scmp.ne.s32.totalorder %s47_s20, %s1973_s3  ;;  %p1979_p3 = scmp.lt.s32.totalorder %s1973_s3, %s1973_s3 }
  0x26   :  { %p1980_p4 = por %p1979_p3, %p1978_p2 }
  0x28   :  { %p1981_p5 = pnand %p1980_p4, %p1974_p1 }
  0x2a   :  { %1984 = shalt.err (!%p1981_p5)
}
  0x2b   :  { %52 = dma.hbm_to_vmem [thread:$0]  %s2411_s2, 512, %s47_s20, [#allocation7], %s2035_s10, %s2035_s10, %s2036_s11  }
  0x2c   :  { %s2039_s25 = smov [#allocation11]  }
  0x2d   :  { %s72_s26 = sshll.u32 %s2039_s25, 4  ;;  %s73_s26 = int_to_ptr.vmem [resolvable:$true] %s72_s26 }
  0x2e   :  { %s1993_s27 = scalar_lea.vmem %s73_s26, 256  ;;  %p1998_p7 = scmp.lt.s32.totalorder %s73_s26, %s73_s26 }
  0x2f   :  { %p1994_p6 = scmp.ne.s32.totalorder %s73_s26, %s1993_s27  ;;  %p1999_p8 = scmp.lt.s32.totalorder %s1993_s27, %s1993_s27 }
  0x31   :  { %p2000_p9 = por %p1999_p8, %p1998_p7 }
  0x33   :  { %p2001_p10 = pnand %p2000_p9, %p1994_p6 }
  0x35   :  { %2004 = shalt.err (!%p2001_p10)
}
  0x36   :  { %78 = dma.hbm_to_vmem [thread:$0]  %s2414_s5, 256, %s73_s26, [#allocation10], %s2035_s10, %s2035_s10, %s2036_s11  }
  0x37   :  { %2025 = dma.done.wait [#allocation4], 512  }
  0x38   :  { %2026 = vsyncadd [#allocation4], 4294966784 }
  0x39   :  { %2027 = dma.done.wait [#allocation7], 1024  }
  0x3a   :  { %2028 = vsyncadd [#allocation7], 4294966272 }
  0x3b   :  { %2029 = dma.done.wait [#allocation10], 512  }
  0x3c   :  { %2030 = vsyncadd [#allocation10], 4294966784  ;;  %vm103_vm0 = vcmask 261120   ;;  %v2040_v0 = vmov 0.0   ;;  %vm2041_vm1 = vmmov 0   ;;  %v2042_v1 = vmov 0  }
  0x3d   :  { %1612 = vmatprep.subr.bf16.mxu0 %v2040_v0  ;;  %1616 = vmatprep.mubr.msk.bf16.mxu0 %vm2041_vm1, %v2040_v0  ;;  %104 = vst.msk [vmem:[#allocation2] sm:$0xff] %vm103_vm0, %v2040_v0  ;;  %v2129_v2 = vld [vmem:[#allocation9 + $0x8] sm:$0xff]   ;;  %v2131_v3 = vld [vmem:[#allocation9] sm:$0xff]   ;;  %v2148_v7 = vld [vmem:[%s2413_s4] sm:$0xff]  }
  0x3e   :  { %1620 = vmatprep.subr.bf16.mxu1 %v2040_v0  ;;  %1624 = vmatprep.mubr.msk.bf16.mxu1 %vm2041_vm1, %v2040_v0  ;;  %v2140_v5 = vld [vmem:[%s2413_s4 + $0x8] sm:$0xff]   ;;  %v2152_v8 = vld [vmem:[#allocation11 + $0x8] sm:$0xff]   ;;  %v2166_v11 = vld [vmem:[#allocation11] sm:$0xff]  }
  0x3f   :  { %1815 = vset.pattern.permute.xlu0 %v2042_v1  ;;  %1816 = vset.pattern.permute.xlu1 %v2042_v1  ;;  %v2157_v9 = vld [vmem:[%s2416_s7] sm:$0xff]  ;;  %v2193_v15 = vld [vmem:[#allocation3] sm:$0xff]  }
  0x40   :  { %1613 = vmatpush3.bf16.msra.mxu0 %v2129_v2  ;;  %1621 = vmatpush3.bf16.msra.mxu1 %v2140_v5  ;;  %vm1497_vm2 = vcmp.gt.s32.totalorder %v2157_v9, 0  ;;  %vm1503_vm3 = vcmp.gt.s32.totalorder %v2157_v9, 1  ;;  %vm1521_vm4 = vcmp.gt.s32.totalorder %v2157_v9, 4  ;;  %vm1533_vm5 = vcmp.gt.s32.totalorder %v2157_v9, 6  ;;  %v2196_v22 = vld [vmem:[#allocation6] sm:$0xff]  }
  0x41   :  { %1614 = vmatprep.subr.bf16.mxu0 %v2040_v0  ;;  %1622 = vmatprep.subr.bf16.mxu1 %v2040_v0  ;;  %v316_v10 = vsel %vm1497_vm2, 1, %v2042_v1  ;;  %v478_v12 = vsel %vm1503_vm3, 1, %v2042_v1  ;;  %v964_v13 = vsel %vm1521_vm4, 1, %v2042_v1  ;;  %v1288_v14 = vsel %vm1533_vm5, 1, %v2042_v1  ;;  %v2202_v37 = vld [vmem:[%s2415_s6] ss:$0 sm:$0xff] }
  0x42   :  { %318 = vperm.xlu0 %1815, %v316_v10   ;;  %v231_v16 = vunpack.c.l.bf16 %v2193_v15  ;;  %v240_v26 = vunpack.c.l.bf16 %v2196_v22  ;;  %v2204_v38 = vld [vmem:[#allocation8] sm:$0xff]   ;;  %vm1509_vm7 = vcmp.gt.s32.totalorder %v2157_v9, 2  ;;  %vm1515_vm8 = vcmp.gt.s32.totalorder %v2157_v9, 3  ;;  %s2043_s6 = smov [#allocation12]  }
  0x43   :  { %v249_v41 = vunpack.c.l.bf16 %v2204_v38  ;;  %v640_v54 = vsel %vm1509_vm7, 1, %v2042_v1  ;;  %v802_v55 = vsel %vm1515_vm8, 1, %v2042_v1  ;;  %vm1527_vm9 = vcmp.gt.s32.totalorder %v2157_v9, 5  ;;  %s1474_s11 = sshll.u32 %s2043_s6, 4  ;;  %s1475_s11 = int_to_ptr.vmem [resolvable:$true] %s1474_s11 }
  0x44   :  { %v2134_v4 = vld [vmem:[#allocation2] sm:$0xff]  ;;  %1615 = vmatpush3.bf16.msra.mxu0 %v2131_v3  ;;  %1623 = vmatpush3.bf16.msra.mxu1 %v2148_v7  ;;  %v1126_v56 = vsel %vm1527_vm9, 1, %v2042_v1  ;;  %vm1539_vm10 = vcmp.gt.s32.totalorder %v2157_v9, 7  ;;  %v408_v58 = vunpack.c.h.bf16 %v2193_v15  ;;  %s2005_s12 = scalar_lea.vmem %s1475_s11, 128  ;;  %p2010_p12 = scmp.lt.s32.totalorder %s1475_s11, %s1475_s11 }
  0x45   :  { %v121_v6 = vpack.c.bf16 %v2134_v4, %v2134_v4  ;;  %1628 = vmatprep.subr.bf16.mxu0 %v2040_v0  ;;  %1636 = vmatprep.subr.bf16.mxu1 %v2040_v0  ;;  %v1450_v57 = vsel %vm1539_vm10, 1, %v2042_v1  ;;  %p2006_p11 = scmp.ne.s32.totalorder %s1475_s11, %s2005_s12  ;;  %p2011_p13 = scmp.lt.s32.totalorder %s2005_s12, %s2005_s12 }
  0x46   :  { %480 = vperm.xlu0 %1815, %v478_v12   ;;  %642 = vperm.xlu1 %1816, %v640_v54  }
  0x47   :  { %1617 = vmatmul.mubr.msk.bf16.vlgmr.msra.gmra.mxu0 %vm103_vm0, %v121_v6  ;;  %1625 = vmatmul.mubr.msk.bf16.vlgmr.msra.gmra.mxu1 %vm103_vm0, %v121_v6  ;;  %p2012_p0 = por %p2011_p13, %p2010_p12 }
  0x48   :  { %1629 = vmatpush3.bf16.msra.mxu0 %v2152_v8  ;;  %1632 = vmatprep.mubr.msk.bf16.mxu0 %vm2041_vm1, %v2040_v0 }
  0x49   :  { %1630 = vmatprep.subr.bf16.mxu0 %v2040_v0  ;;  %1637 = vmatpush3.bf16.msra.mxu1 %v2129_v2  ;;  %p2013_p1 = pnand %p2012_p0, %p2006_p11 }
  0x4a   :  { %1640 = vmatprep.mubr.msk.bf16.mxu1 %vm2041_vm1, %v2040_v0  ;;  %1638 = vmatprep.subr.bf16.mxu1 %v2040_v0 }
  0x4b   :  { %966 = vperm.xlu0 %1815, %v964_v13   ;;  %804 = vperm.xlu1 %1816, %v802_v55  }
  0x4c   :  { %1631 = vmatpush3.bf16.msra.mxu0 %v2166_v11 }
  0x4d   :  { %1644 = vmatprep.subr.bf16.mxu0 %v2040_v0  ;;  %1639 = vmatpush3.bf16.msra.mxu1 %v2131_v3 }
  0x4e   :  { %1652 = vmatprep.subr.bf16.mxu1 %v2040_v0 }
  0x4f   :  { %1633 = vmatmul.mubr.msk.bf16.vlgmr.msra.gmra.mxu0 %vm103_vm0, %v121_v6  ;;  %1290 = vperm.xlu0 %1815, %v1288_v14   ;;  %v418_v14 = vunpack.c.h.bf16 %v2196_v22 }
  0x50   :  { %1645 = vmatpush3.bf16.msra.mxu0 %v2140_v5  ;;  %1648 = vmatprep.mubr.msk.bf16.mxu0 %vm2041_vm1, %v2040_v0 }
  0x51   :  { %1646 = vmatprep.subr.bf16.mxu0 %v2040_v0  ;;  %1128 = vperm.xlu1 %1816, %v1126_v56  }
  0x54   :  { %1647 = vmatpush3.bf16.msra.mxu0 %v2148_v7 }
  0x55   :  { %1660 = vmatprep.subr.bf16.mxu0 %v2040_v0  ;;  %1452 = vperm.xlu1 %1816, %v1450_v57  }
  0xbd   :  { %v319_v49 = vpop.permute.xlu0 %318 }
  0xbe   :  { %vm320_vm6 = vcmp.eq.s32.totalorder %v319_v49, 1 }
 0x107   :  { %v172_v17 = vpop.f32.mrf.mxu0  ;;  %v224_v21 = vpop.f32.mrf.mxu1 }
 0x108   :  { %v232_v18 = vadd.f32 %v231_v16, %v172_v17  ;;  %v241_v30 = vadd.f32 %v240_v26, %v224_v21 }
 0x109   :  { %v1618_v19 = vpop.f32.mrf.mxu0  ;;  %v1626_v24 = vpop.f32.mrf.mxu1 }
 0x10a   :  { %v1491_v20 = vmul.f32 -1.442695, %v232_v18  ;;  %v1492_v33 = vmul.f32 -1.442695, %v241_v30 }
 0x10b   :  { %v175_v23 = vpop.f32.mrf.mxu0  ;;  %v227_v27 = vpop.f32.mrf.mxu1 }
 0x10c   :  { %1823 = vpow2.f32 %v1491_v20  ;;  %v428_v23 = vunpack.c.h.bf16 %v2204_v38 }
 0x10d   :  { %v1619_v25 = vpop.f32.mrf.mxu0  ;;  %v1627_v29 = vpop.f32.mrf.mxu1  ;;  %1825 = vpow2.f32 %v1492_v33 }
 0x10f   :  { %v302_v28 = vpop.f32.mrf.mxu0 }
 0x110   :  { %v303_v40 = vadd.f32 %v2202_v37, %v302_v28 }
 0x111   :  { %v1634_v31 = vpop.f32.mrf.mxu0 }
 0x113   :  { %v305_v32 = vpop.f32.mrf.mxu0 }
 0x114   :  { %v481_v32 = vpop.permute.xlu0 %480 }
 0x115   :  { %v1635_v34 = vpop.f32.mrf.mxu0  ;;  %vm482_vm11 = vcmp.eq.s32.totalorder %v481_v32, 1 }
 0x119   :  { %v1824_v35 = vpop.eup %1823 }
 0x11a   :  { %v236_v36 = vadd.f32 1.0, %v1824_v35  ;;  %v1826_v39 = vpop.eup %1825 }
 0x11b   :  { %v245_v43 = vadd.f32 1.0, %v1826_v39 }
 0x11c   :  { %1827 = vrcp.f32 %v236_v36  ;;  %v2274_v36 = vld [vmem:[#allocation3 + $0x8] sm:$0xff]  }
 0x11d   :  { %1829 = vrcp.f32 %v245_v43  ;;  %v570_v38 = vunpack.c.l.bf16 %v2274_v36 }
 0x129   :  { %v1828_v42 = vpop.eup %1827 }
 0x12a   :  { %v308_v44 = vmul.f32 %v1828_v42, %v303_v40  ;;  %v1830_v46 = vpop.eup %1829 }
 0x12c   :  { %v309_v45 = vadd.f32 %v308_v44, %v249_v41 }
 0x12e   :  { %1831 = vtanh.f32 %v309_v45 }
 0x13b   :  { %v1832_v47 = vpop.eup %1831 }
 0x13c   :  { %v311_v48 = vsub.f32 %v2134_v4, %v1832_v47 }
 0x13e   :  { %v312_v50 = vmul.f32 %v1830_v46, %v311_v48 }
 0x140   :  { %v313_v51 = vadd.f32 %v1832_v47, %v312_v50  ;;  %v2277_v47 = vld [vmem:[#allocation6 + $0x8] sm:$0xff]  }
 0x141   :  { %v580_v50 = vunpack.c.l.bf16 %v2277_v47 }
 0x142   :  { %v2210_v52 = vsel %vm320_vm6, %v313_v51, %v2134_v4 }
 0x143   :  { %v322_v53 = vpack.c.bf16 %v2210_v52, %v2210_v52 }
 0x145   :  { %1641 = vmatmul.mubr.msk.bf16.vlgmr.msra.gmra.mxu1 %vm103_vm0, %v322_v53  ;;  %1649 = vmatmul.mubr.msk.bf16.vlgmr.msra.gmra.mxu0 %vm103_vm0, %v322_v53 }
 0x146   :  { %1653 = vmatpush3.bf16.msra.mxu1 %v2152_v8  ;;  %1656 = vmatprep.mubr.msk.bf16.mxu1 %vm2041_vm1, %v2040_v0 }
 0x147   :  { %1654 = vmatprep.subr.bf16.mxu1 %v2040_v0  ;;  %1661 = vmatpush3.bf16.msra.mxu0 %v2129_v2 }
 0x148   :  { %1662 = vmatprep.subr.bf16.mxu0 %v2040_v0  ;;  %1664 = vmatprep.mubr.msk.bf16.mxu0 %vm2041_vm1, %v2040_v0 }
 0x14a   :  { %1655 = vmatpush3.bf16.msra.mxu1 %v2166_v11 }
 0x14b   :  { %1668 = vmatprep.subr.bf16.mxu1 %v2040_v0  ;;  %1663 = vmatpush3.bf16.msra.mxu0 %v2131_v3 }
 0x14c   :  { %1676 = vmatprep.subr.bf16.mxu0 %v2040_v0 }
 0x14d   :  { %1657 = vmatmul.mubr.msk.bf16.vlgmr.msra.gmra.mxu1 %vm103_vm0, %v322_v53 }
 0x14e   :  { %1669 = vmatpush3.bf16.msra.mxu1 %v2140_v5  ;;  %1672 = vmatprep.mubr.msk.bf16.mxu1 %vm2041_vm1, %v2040_v0 }
 0x14f   :  { %1670 = vmatprep.subr.bf16.mxu1 %v2040_v0 }
 0x152   :  { %1671 = vmatpush3.bf16.msra.mxu1 %v2148_v7 }
 0x153   :  { %1684 = vmatprep.subr.bf16.mxu1 %v2040_v0 }
 0x205   :  { %v360_v59 = vpop.f32.mrf.mxu1  ;;  %v400_v60 = vpop.f32.mrf.mxu0 }
 0x206   :  { %v409_v61 = vadd.f32 %v408_v58, %v360_v59  ;;  %v419_v17 = vadd.f32 %v418_v14, %v400_v60  ;;  %v2280_v59 = vld [vmem:[#allocation8 + $0x8] sm:$0xff]  }
 0x207   :  { %v1642_v62 = vpop.f32.mrf.mxu1  ;;  %v1650_v63 = vpop.f32.mrf.mxu0 }
 0x208   :  { %v1500_v4 = vmul.f32 -1.442695, %v409_v61  ;;  %v1501_v19 = vmul.f32 -1.442695, %v419_v17  ;;  %v590_v61 = vunpack.c.l.bf16 %v2280_v59 }
 0x209   :  { %v363_v6 = vpop.f32.mrf.mxu1  ;;  %v403_v10 = vpop.f32.mrf.mxu0 }
 0x20a   :  { %1833 = vpow2.f32 %v1500_v4 }
 0x20b   :  { %v1643_v12 = vpop.f32.mrf.mxu1  ;;  %v1651_v13 = vpop.f32.mrf.mxu0  ;;  %1835 = vpow2.f32 %v1501_v19  ;;  %v732_v19 = vunpack.c.h.bf16 %v2274_v36 }
 0x20d   :  { %v463_v9 = vpop.f32.mrf.mxu1 }
 0x20e   :  { %v464_v24 = vadd.f32 %v2202_v37, %v463_v9  ;;  %v643_v9 = vpop.permute.xlu1 %642 }
 0x20f   :  { %v1658_v16 = vpop.f32.mrf.mxu1  ;;  %vm644_vm12 = vcmp.eq.s32.totalorder %v643_v9, 1 }
 0x211   :  { %v466_v1 = vpop.f32.mrf.mxu1 }
 0x213   :  { %v1659_v18 = vpop.f32.mrf.mxu1 }
 0x217   :  { %v1834_v15 = vpop.eup %1833 }
 0x218   :  { %v413_v20 = vadd.f32 1.0, %v1834_v15  ;;  %v1836_v21 = vpop.eup %1835 }
 0x219   :  { %v423_v27 = vadd.f32 1.0, %v1836_v21 }
 0x21a   :  { %1837 = vrcp.f32 %v413_v20 }
 0x227   :  { %v1838_v25 = vpop.eup %1837 }
 0x228   :  { %v469_v26 = vmul.f32 %v1838_v25, %v464_v24 }
 0x22a   :  { %v470_v28 = vadd.f32 %v469_v26, %v428_v23 }
 0x22c   :  { %1839 = vtanh.f32 %v470_v28 }
 0x22d   :  { %1841 = vrcp.f32 %v423_v27 }
 0x239   :  { %v1840_v22 = vpop.eup %1839 }
 0x23a   :  { %v472_v29 = vsub.f32 %v2210_v52, %v1840_v22  ;;  %v1842_v30 = vpop.eup %1841 }
 0x23c   :  { %v473_v31 = vmul.f32 %v1842_v30, %v472_v29  ;;  %v742_v29 = vunpack.c.h.bf16 %v2277_v47 }
 0x23e   :  { %v474_v33 = vadd.f32 %v1840_v22, %v473_v31 }
 0x240   :  { %v2249_v34 = vsel %vm482_vm11, %v474_v33, %v2210_v52 }
 0x241   :  { %v484_v35 = vpack.c.bf16 %v2249_v34, %v2249_v34 }
 0x243   :  { %1665 = vmatmul.mubr.msk.bf16.vlgmr.msra.gmra.mxu0 %vm103_vm0, %v484_v35  ;;  %1673 = vmatmul.mubr.msk.bf16.vlgmr.msra.gmra.mxu1 %vm103_vm0, %v484_v35 }
 0x244   :  { %1677 = vmatpush3.bf16.msra.mxu0 %v2152_v8  ;;  %1680 = vmatprep.mubr.msk.bf16.mxu0 %vm2041_vm1, %v2040_v0 }
 0x245   :  { %1678 = vmatprep.subr.bf16.mxu0 %v2040_v0  ;;  %1685 = vmatpush3.bf16.msra.mxu1 %v2129_v2 }
 0x246   :  { %1686 = vmatprep.subr.bf16.mxu1 %v2040_v0  ;;  %1688 = vmatprep.mubr.msk.bf16.mxu1 %vm2041_vm1, %v2040_v0 }
 0x248   :  { %1679 = vmatpush3.bf16.msra.mxu0 %v2166_v11 }
 0x249   :  { %1692 = vmatprep.subr.bf16.mxu0 %v2040_v0  ;;  %1687 = vmatpush3.bf16.msra.mxu1 %v2131_v3 }
 0x24a   :  { %1700 = vmatprep.subr.bf16.mxu1 %v2040_v0 }
 0x24b   :  { %1681 = vmatmul.mubr.msk.bf16.vlgmr.msra.gmra.mxu0 %vm103_vm0, %v484_v35 }
 0x24c   :  { %1693 = vmatpush3.bf16.msra.mxu0 %v2140_v5  ;;  %1696 = vmatprep.mubr.msk.bf16.mxu0 %vm2041_vm1, %v2040_v0 }
 0x24d   :  { %1694 = vmatprep.subr.bf16.mxu0 %v2040_v0 }
 0x250   :  { %1695 = vmatpush3.bf16.msra.mxu0 %v2148_v7 }
 0x251   :  { %1708 = vmatprep.subr.bf16.mxu0 %v2040_v0 }
 0x303   :  { %v522_v39 = vpop.f32.mrf.mxu0  ;;  %v562_v40 = vpop.f32.mrf.mxu1 }
 0x304   :  { %v571_v41 = vadd.f32 %v570_v38, %v522_v39  ;;  %v581_v53 = vadd.f32 %v580_v50, %v562_v40  ;;  %v752_v40 = vunpack.c.h.bf16 %v2280_v59  ;;  %v805_v50 = vpop.permute.xlu1 %804 }
 0x305   :  { %v1666_v42 = vpop.f32.mrf.mxu0  ;;  %v1674_v43 = vpop.f32.mrf.mxu1  ;;  %vm806_vm13 = vcmp.eq.s32.totalorder %v805_v50, 1 }
 0x306   :  { %v1506_v44 = vmul.f32 -1.442695, %v571_v41  ;;  %v1507_v56 = vmul.f32 -1.442695, %v581_v53 }
 0x307   :  { %v525_v45 = vpop.f32.mrf.mxu0  ;;  %v565_v46 = vpop.f32.mrf.mxu1 }
 0x308   :  { %1843 = vpow2.f32 %v1506_v44 }
 0x309   :  { %v1667_v48 = vpop.f32.mrf.mxu0  ;;  %v1675_v49 = vpop.f32.mrf.mxu1  ;;  %1845 = vpow2.f32 %v1507_v56 }
 0x30b   :  { %v625_v51 = vpop.f32.mrf.mxu0 }
 0x30c   :  { %v626_v62 = vadd.f32 %v2202_v37, %v625_v51 }
 0x30d   :  { %v1682_v52 = vpop.f32.mrf.mxu0 }
 0x30f   :  { %v628_v54 = vpop.f32.mrf.mxu0 }
 0x310   :  { %v2336_v54 = vld [vmem:[#allocation3 + $0x10] sm:$0xff]  }
 0x311   :  { %v1683_v55 = vpop.f32.mrf.mxu0 }
 0x312   :  { %v894_v55 = vunpack.c.l.bf16 %v2336_v54 }
 0x315   :  { %v1844_v57 = vpop.eup %1843 }
 0x316   :  { %v575_v58 = vadd.f32 1.0, %v1844_v57  ;;  %v1846_v60 = vpop.eup %1845 }
 0x317   :  { %v585_v6 = vadd.f32 1.0, %v1846_v60 }
 0x318   :  { %1847 = vrcp.f32 %v575_v58 }
 0x325   :  { %v1848_v63 = vpop.eup %1847 }
 0x326   :  { %v631_v4 = vmul.f32 %v1848_v63, %v626_v62 }
 0x328   :  { %v632_v10 = vadd.f32 %v631_v4, %v590_v61  ;;  %v2339_v4 = vld [vmem:[#allocation6 + $0x10] sm:$0xff]  }
 0x32a   :  { %1849 = vtanh.f32 %v632_v10 }
 0x32b   :  { %1851 = vrcp.f32 %v585_v6 }
 0x337   :  { %v1850_v12 = vpop.eup %1849 }
 0x338   :  { %v634_v13 = vsub.f32 %v2249_v34, %v1850_v12  ;;  %v1852_v14 = vpop.eup %1851 }
 0x33a   :  { %v635_v16 = vmul.f32 %v1852_v14, %v634_v13 }
 0x33c   :  { %v636_v17 = vadd.f32 %v1850_v12, %v635_v16  ;;  %v904_v12 = vunpack.c.l.bf16 %v2339_v4 }
 0x33e   :  { %v645_v1 = vsel %vm644_vm12, %v636_v17, %v2249_v34 }
 0x33f   :  { %v646_v18 = vpack.c.bf16 %v645_v1, %v645_v1 }
 0x341   :  { %1689 = vmatmul.mubr.msk.bf16.vlgmr.msra.gmra.mxu1 %vm103_vm0, %v646_v18  ;;  %1697 = vmatmul.mubr.msk.bf16.vlgmr.msra.gmra.mxu0 %vm103_vm0, %v646_v18 }
 0x342   :  { %1701 = vmatpush3.bf16.msra.mxu1 %v2152_v8  ;;  %1704 = vmatprep.mubr.msk.bf16.mxu1 %vm2041_vm1, %v2040_v0 }
 0x343   :  { %1702 = vmatprep.subr.bf16.mxu1 %v2040_v0  ;;  %1709 = vmatpush3.bf16.msra.mxu0 %v2129_v2 }
 0x344   :  { %1710 = vmatprep.subr.bf16.mxu0 %v2040_v0  ;;  %1712 = vmatprep.mubr.msk.bf16.mxu0 %vm2041_vm1, %v2040_v0 }
 0x346   :  { %1703 = vmatpush3.bf16.msra.mxu1 %v2166_v11 }
 0x347   :  { %1716 = vmatprep.subr.bf16.mxu1 %v2040_v0  ;;  %1711 = vmatpush3.bf16.msra.mxu0 %v2131_v3 }
 0x348   :  { %1724 = vmatprep.subr.bf16.mxu0 %v2040_v0 }
 0x349   :  { %1705 = vmatmul.mubr.msk.bf16.vlgmr.msra.gmra.mxu1 %vm103_vm0, %v646_v18 }
 0x34a   :  { %1717 = vmatpush3.bf16.msra.mxu1 %v2140_v5  ;;  %1720 = vmatprep.mubr.msk.bf16.mxu1 %vm2041_vm1, %v2040_v0 }
 0x34b   :  { %1718 = vmatprep.subr.bf16.mxu1 %v2040_v0 }
 0x34e   :  { %1719 = vmatpush3.bf16.msra.mxu1 %v2148_v7 }
 0x34f   :  { %1732 = vmatprep.subr.bf16.mxu1 %v2040_v0 }
 0x401   :  { %v684_v15 = vpop.f32.mrf.mxu1  ;;  %v724_v20 = vpop.f32.mrf.mxu0 }
 0x402   :  { %v733_v21 = vadd.f32 %v732_v19, %v684_v15  ;;  %v743_v32 = vadd.f32 %v742_v29, %v724_v20  ;;  %v2342_v15 = vld [vmem:[#allocation8 + $0x10] sm:$0xff]  }
 0x403   :  { %v1690_v23 = vpop.f32.mrf.mxu1  ;;  %v1698_v24 = vpop.f32.mrf.mxu0 }
 0x404   :  { %v1512_v25 = vmul.f32 -1.442695, %v733_v21  ;;  %v1513_v35 = vmul.f32 -1.442695, %v743_v32  ;;  %v914_v21 = vunpack.c.l.bf16 %v2342_v15 }
 0x405   :  { %v687_v26 = vpop.f32.mrf.mxu1  ;;  %v727_v27 = vpop.f32.mrf.mxu0 }
 0x406   :  { %1853 = vpow2.f32 %v1512_v25 }
 0x407   :  { %v1691_v28 = vpop.f32.mrf.mxu1  ;;  %v1699_v22 = vpop.f32.mrf.mxu0  ;;  %1855 = vpow2.f32 %v1513_v35  ;;  %v1056_v35 = vunpack.c.h.bf16 %v2336_v54 }
 0x409   :  { %v787_v30 = vpop.f32.mrf.mxu1 }
 0x40a   :  { %v788_v41 = vadd.f32 %v2202_v37, %v787_v30 }
 0x40b   :  { %v1706_v31 = vpop.f32.mrf.mxu1 }
 0x40c   :  { %v967_v31 = vpop.permute.xlu0 %966 }
 0x40d   :  { %v790_v33 = vpop.f32.mrf.mxu1  ;;  %vm968_vm14 = vcmp.eq.s32.totalorder %v967_v31, 1 }
 0x40f   :  { %v1707_v34 = vpop.f32.mrf.mxu1 }
 0x413   :  { %v1854_v36 = vpop.eup %1853 }
 0x414   :  { %v737_v38 = vadd.f32 1.0, %v1854_v36  ;;  %v1856_v39 = vpop.eup %1855 }
 0x415   :  { %v747_v44 = vadd.f32 1.0, %v1856_v39 }
 0x416   :  { %1857 = vrcp.f32 %v737_v38 }
 0x423   :  { %v1858_v42 = vpop.eup %1857 }
 0x424   :  { %v793_v43 = vmul.f32 %v1858_v42, %v788_v41 }
 0x426   :  { %v794_v45 = vadd.f32 %v793_v43, %v752_v40 }
 0x428   :  { %1859 = vtanh.f32 %v794_v45 }
 0x429   :  { %1861 = vrcp.f32 %v747_v44 }
 0x435   :  { %v1860_v46 = vpop.eup %1859 }
 0x436   :  { %v796_v47 = vsub.f32 %v645_v1, %v1860_v46  ;;  %v1862_v48 = vpop.eup %1861 }
 0x438   :  { %v797_v49 = vmul.f32 %v1862_v48, %v796_v47  ;;  %v1066_v47 = vunpack.c.h.bf16 %v2339_v4 }
 0x43a   :  { %v798_v51 = vadd.f32 %v1860_v46, %v797_v49 }
 0x43c   :  { %v2311_v52 = vsel %vm806_vm13, %v798_v51, %v645_v1 }
 0x43d   :  { %v808_v53 = vpack.c.bf16 %v2311_v52, %v2311_v52 }
 0x43f   :  { %1713 = vmatmul.mubr.msk.bf16.vlgmr.msra.gmra.mxu0 %vm103_vm0, %v808_v53  ;;  %1721 = vmatmul.mubr.msk.bf16.vlgmr.msra.gmra.mxu1 %vm103_vm0, %v808_v53 }
 0x440   :  { %1725 = vmatpush3.bf16.msra.mxu0 %v2152_v8  ;;  %1728 = vmatprep.mubr.msk.bf16.mxu0 %vm2041_vm1, %v2040_v0 }
 0x441   :  { %1726 = vmatprep.subr.bf16.mxu0 %v2040_v0  ;;  %1733 = vmatpush3.bf16.msra.mxu1 %v2129_v2 }
 0x442   :  { %1734 = vmatprep.subr.bf16.mxu1 %v2040_v0  ;;  %1736 = vmatprep.mubr.msk.bf16.mxu1 %vm2041_vm1, %v2040_v0 }
 0x444   :  { %1727 = vmatpush3.bf16.msra.mxu0 %v2166_v11 }
 0x445   :  { %1740 = vmatprep.subr.bf16.mxu0 %v2040_v0  ;;  %1735 = vmatpush3.bf16.msra.mxu1 %v2131_v3 }
 0x446   :  { %1748 = vmatprep.subr.bf16.mxu1 %v2040_v0 }
 0x447   :  { %1729 = vmatmul.mubr.msk.bf16.vlgmr.msra.gmra.mxu0 %vm103_vm0, %v808_v53 }
 0x448   :  { %1741 = vmatpush3.bf16.msra.mxu0 %v2140_v5  ;;  %1744 = vmatprep.mubr.msk.bf16.mxu0 %vm2041_vm1, %v2040_v0 }
 0x449   :  { %1742 = vmatprep.subr.bf16.mxu0 %v2040_v0 }
 0x44c   :  { %1743 = vmatpush3.bf16.msra.mxu0 %v2148_v7 }
 0x44d   :  { %1756 = vmatprep.subr.bf16.mxu0 %v2040_v0 }
 0x4ff   :  { %v846_v56 = vpop.f32.mrf.mxu0  ;;  %v886_v57 = vpop.f32.mrf.mxu1 }
 0x500   :  { %v895_v58 = vadd.f32 %v894_v55, %v846_v56  ;;  %v905_v9 = vadd.f32 %v904_v12, %v886_v57  ;;  %v1076_v57 = vunpack.c.h.bf16 %v2342_v15  ;;  %v1129_v12 = vpop.permute.xlu1 %1128 }
 0x501   :  { %v1714_v59 = vpop.f32.mrf.mxu0  ;;  %v1722_v60 = vpop.f32.mrf.mxu1  ;;  %vm1130_vm15 = vcmp.eq.s32.totalorder %v1129_v12, 1 }
 0x502   :  { %v1518_v61 = vmul.f32 -1.442695, %v895_v58  ;;  %v1519_v1 = vmul.f32 -1.442695, %v905_v9 }
 0x503   :  { %v849_v62 = vpop.f32.mrf.mxu0  ;;  %v889_v63 = vpop.f32.mrf.mxu1 }
 0x504   :  { %1863 = vpow2.f32 %v1518_v61 }
 0x505   :  { %v1715_v6 = vpop.f32.mrf.mxu0  ;;  %v1723_v10 = vpop.f32.mrf.mxu1  ;;  %1865 = vpow2.f32 %v1519_v1 }
 0x507   :  { %v949_v13 = vpop.f32.mrf.mxu0 }
 0x508   :  { %v950_v23 = vadd.f32 %v2202_v37, %v949_v13 }
 0x509   :  { %v1730_v14 = vpop.f32.mrf.mxu0 }
 0x50b   :  { %v952_v16 = vpop.f32.mrf.mxu0 }
 0x50d   :  { %v1731_v17 = vpop.f32.mrf.mxu0 }
 0x511   :  { %v1864_v18 = vpop.eup %1863 }
 0x512   :  { %v899_v19 = vadd.f32 1.0, %v1864_v18  ;;  %v1866_v20 = vpop.eup %1865 }
 0x513   :  { %v909_v26 = vadd.f32 1.0, %v1866_v20 }
 0x514   :  { %1867 = vrcp.f32 %v899_v19 }
 0x521   :  { %v1868_v24 = vpop.eup %1867 }
 0x522   :  { %v955_v25 = vmul.f32 %v1868_v24, %v950_v23  ;;  %v1227_v23 = vld [vmem:[#allocation6 + $0x18] sm:$0xff]  }
 0x524   :  { %v956_v27 = vadd.f32 %v955_v25, %v914_v21  ;;  %v1228_v25 = vunpack.c.l.bf16 %v1227_v23 }
 0x526   :  { %1869 = vtanh.f32 %v956_v27 }
 0x527   :  { %1871 = vrcp.f32 %v909_v26 }
 0x533   :  { %v1870_v28 = vpop.eup %1869 }
 0x534   :  { %v958_v22 = vsub.f32 %v2311_v52, %v1870_v28  ;;  %v1872_v29 = vpop.eup %1871 }
 0x536   :  { %v959_v30 = vmul.f32 %v1872_v29, %v958_v22 }
 0x538   :  { %v960_v32 = vadd.f32 %v1870_v28, %v959_v30 }
 0x53a   :  { %v969_v33 = vsel %vm968_vm14, %v960_v32, %v2311_v52  ;;  %v1237_v32 = vld [vmem:[#allocation8 + $0x18] sm:$0xff]  }
 0x53b   :  { %v970_v34 = vpack.c.bf16 %v969_v33, %v969_v33  ;;  %v1400_v12 = vunpack.c.h.bf16 %v1237_v32 }
 0x53d   :  { %1737 = vmatmul.mubr.msk.bf16.vlgmr.msra.gmra.mxu1 %vm103_vm0, %v970_v34  ;;  %1745 = vmatmul.mubr.msk.bf16.vlgmr.msra.gmra.mxu0 %vm103_vm0, %v970_v34 }
 0x53e   :  { %1749 = vmatpush3.bf16.msra.mxu1 %v2152_v8  ;;  %1752 = vmatprep.mubr.msk.bf16.mxu1 %vm2041_vm1, %v2040_v0 }
 0x53f   :  { %1750 = vmatprep.subr.bf16.mxu1 %v2040_v0  ;;  %1757 = vmatpush3.bf16.msra.mxu0 %v2129_v2 }
 0x540   :  { %1758 = vmatprep.subr.bf16.mxu0 %v2040_v0  ;;  %1760 = vmatprep.mubr.msk.bf16.mxu0 %vm2041_vm1, %v2040_v0 }
 0x542   :  { %1751 = vmatpush3.bf16.msra.mxu1 %v2166_v11 }
 0x543   :  { %1764 = vmatprep.subr.bf16.mxu1 %v2040_v0  ;;  %1759 = vmatpush3.bf16.msra.mxu0 %v2131_v3 }
 0x544   :  { %1772 = vmatprep.subr.bf16.mxu0 %v2040_v0 }
 0x545   :  { %1753 = vmatmul.mubr.msk.bf16.vlgmr.msra.gmra.mxu1 %vm103_vm0, %v970_v34  ;;  %v1238_v34 = vunpack.c.l.bf16 %v1237_v32 }
 0x546   :  { %1765 = vmatpush3.bf16.msra.mxu1 %v2140_v5  ;;  %1768 = vmatprep.mubr.msk.bf16.mxu1 %vm2041_vm1, %v2040_v0 }
 0x547   :  { %1766 = vmatprep.subr.bf16.mxu1 %v2040_v0 }
 0x54a   :  { %1767 = vmatpush3.bf16.msra.mxu1 %v2148_v7 }
 0x54b   :  { %1780 = vmatprep.subr.bf16.mxu1 %v2040_v0 }
 0x5fd   :  { %v1008_v36 = vpop.f32.mrf.mxu1  ;;  %v1048_v38 = vpop.f32.mrf.mxu0 }
 0x5fe   :  { %v1057_v39 = vadd.f32 %v1056_v35, %v1008_v36  ;;  %v1067_v50 = vadd.f32 %v1066_v47, %v1048_v38 }
 0x5ff   :  { %v1738_v40 = vpop.f32.mrf.mxu1  ;;  %v1746_v41 = vpop.f32.mrf.mxu0 }
 0x600   :  { %v1524_v42 = vmul.f32 -1.442695, %v1057_v39  ;;  %v1525_v53 = vmul.f32 -1.442695, %v1067_v50 }
 0x601   :  { %v1011_v43 = vpop.f32.mrf.mxu1  ;;  %v1051_v44 = vpop.f32.mrf.mxu0 }
 0x602   :  { %1873 = vpow2.f32 %v1524_v42  ;;  %v1291_v44 = vpop.permute.xlu0 %1290 }
 0x603   :  { %v1739_v45 = vpop.f32.mrf.mxu1  ;;  %v1747_v46 = vpop.f32.mrf.mxu0  ;;  %1875 = vpow2.f32 %v1525_v53  ;;  %vm1292_vm2 = vcmp.eq.s32.totalorder %v1291_v44, 1 }
 0x605   :  { %v1111_v48 = vpop.f32.mrf.mxu1 }
 0x606   :  { %v1112_v58 = vadd.f32 %v2202_v37, %v1111_v48 }
 0x607   :  { %v1754_v49 = vpop.f32.mrf.mxu1 }
 0x609   :  { %v1114_v51 = vpop.f32.mrf.mxu1 }
 0x60b   :  { %v1755_v52 = vpop.f32.mrf.mxu1 }
 0x60f   :  { %v1874_v54 = vpop.eup %1873 }
 0x610   :  { %v1061_v55 = vadd.f32 1.0, %v1874_v54  ;;  %v1876_v56 = vpop.eup %1875 }
 0x611   :  { %v1071_v61 = vadd.f32 1.0, %v1876_v56 }
 0x612   :  { %1877 = vrcp.f32 %v1061_v55 }
 0x61f   :  { %v1878_v59 = vpop.eup %1877 }
 0x620   :  { %v1117_v60 = vmul.f32 %v1878_v59, %v1112_v58  ;;  %v1390_v59 = vunpack.c.h.bf16 %v1227_v23 }
 0x622   :  { %v1118_v62 = vadd.f32 %v1117_v60, %v1076_v57 }
 0x624   :  { %1879 = vtanh.f32 %v1118_v62 }
 0x625   :  { %1881 = vrcp.f32 %v1071_v61 }
 0x631   :  { %v1880_v63 = vpop.eup %1879 }
 0x632   :  { %v1120_v4 = vsub.f32 %v969_v33, %v1880_v63  ;;  %v1882_v6 = vpop.eup %1881 }
 0x634   :  { %v1121_v10 = vmul.f32 %v1882_v6, %v1120_v4 }
 0x636   :  { %v1122_v13 = vadd.f32 %v1880_v63, %v1121_v10 }
 0x638   :  { %v1131_v14 = vsel %vm1130_vm15, %v1122_v13, %v969_v33 }
 0x639   :  { %v1132_v9 = vpack.c.bf16 %v1131_v14, %v1131_v14 }
 0x63b   :  { %1761 = vmatmul.mubr.msk.bf16.vlgmr.msra.gmra.mxu0 %vm103_vm0, %v1132_v9  ;;  %1769 = vmatmul.mubr.msk.bf16.vlgmr.msra.gmra.mxu1 %vm103_vm0, %v1132_v9 }
 0x63c   :  { %1773 = vmatpush3.bf16.msra.mxu0 %v2152_v8  ;;  %1776 = vmatprep.mubr.msk.bf16.mxu0 %vm2041_vm1, %v2040_v0 }
 0x63d   :  { %1774 = vmatprep.subr.bf16.mxu0 %v2040_v0  ;;  %1781 = vmatpush3.bf16.msra.mxu1 %v2129_v2  ;;  %v1217_v2 = vld [vmem:[#allocation3 + $0x18] sm:$0xff]  }
 0x63e   :  { %1782 = vmatprep.subr.bf16.mxu1 %v2040_v0  ;;  %1784 = vmatprep.mubr.msk.bf16.mxu1 %vm2041_vm1, %v2040_v0  ;;  %v1218_v16 = vunpack.c.l.bf16 %v1217_v2  ;;  %v1380_v49 = vunpack.c.h.bf16 %v1217_v2 }
 0x640   :  { %1775 = vmatpush3.bf16.msra.mxu0 %v2166_v11 }
 0x641   :  { %1788 = vmatprep.subr.bf16.mxu0 %v2040_v0  ;;  %1783 = vmatpush3.bf16.msra.mxu1 %v2131_v3 }
 0x642   :  { %1796 = vmatprep.subr.bf16.mxu1 %v2040_v0 }
 0x643   :  { %1777 = vmatmul.mubr.msk.bf16.vlgmr.msra.gmra.mxu0 %vm103_vm0, %v1132_v9 }
 0x644   :  { %1789 = vmatpush3.bf16.msra.mxu0 %v2140_v5  ;;  %1792 = vmatprep.mubr.msk.bf16.mxu0 %vm2041_vm1, %v2040_v0 }
 0x645   :  { %1790 = vmatprep.subr.bf16.mxu0 %v2040_v0 }
 0x648   :  { %1791 = vmatpush3.bf16.msra.mxu0 %v2148_v7 }
 0x6fb   :  { %v1170_v17 = vpop.f32.mrf.mxu0  ;;  %v1210_v1 = vpop.f32.mrf.mxu1 }
 0x6fc   :  { %v1219_v18 = vadd.f32 %v1218_v16, %v1170_v17  ;;  %v1229_v28 = vadd.f32 %v1228_v25, %v1210_v1 }
 0x6fd   :  { %v1762_v19 = vpop.f32.mrf.mxu0  ;;  %v1770_v3 = vpop.f32.mrf.mxu1 }
 0x6fe   :  { %v1530_v15 = vmul.f32 -1.442695, %v1219_v18  ;;  %v1531_v29 = vmul.f32 -1.442695, %v1229_v28  ;;  %v1453_v19 = vpop.permute.xlu1 %1452 }
 0x6ff   :  { %v1173_v20 = vpop.f32.mrf.mxu0  ;;  %v1213_v21 = vpop.f32.mrf.mxu1 }
 0x700   :  { %1883 = vpow2.f32 %v1530_v15 }
 0x701   :  { %v1763_v5 = vpop.f32.mrf.mxu0  ;;  %v1771_v24 = vpop.f32.mrf.mxu1  ;;  %1885 = vpow2.f32 %v1531_v29 }
 0x703   :  { %v1273_v26 = vpop.f32.mrf.mxu0 }
 0x704   :  { %v1274_v35 = vadd.f32 %v2202_v37, %v1273_v26 }
 0x705   :  { %v1778_v27 = vpop.f32.mrf.mxu0 }
 0x707   :  { %v1276_v22 = vpop.f32.mrf.mxu0 }
 0x709   :  { %v1779_v7 = vpop.f32.mrf.mxu0 }
 0x70d   :  { %v1884_v30 = vpop.eup %1883 }
 0x70e   :  { %v1223_v31 = vadd.f32 1.0, %v1884_v30  ;;  %v1886_v33 = vpop.eup %1885 }
 0x70f   :  { %v1233_v39 = vadd.f32 1.0, %v1886_v33 }
 0x710   :  { %1887 = vrcp.f32 %v1223_v31 }
 0x71d   :  { %v1888_v36 = vpop.eup %1887 }
 0x71e   :  { %v1279_v38 = vmul.f32 %v1888_v36, %v1274_v35 }
 0x720   :  { %v1280_v40 = vadd.f32 %v1279_v38, %v1238_v34 }
 0x722   :  { %1889 = vtanh.f32 %v1280_v40 }
 0x723   :  { %1891 = vrcp.f32 %v1233_v39 }
 0x72f   :  { %v1890_v41 = vpop.eup %1889 }
 0x730   :  { %v1282_v42 = vsub.f32 %v1131_v14, %v1890_v41  ;;  %v1892_v43 = vpop.eup %1891 }
 0x732   :  { %v1283_v45 = vmul.f32 %v1892_v43, %v1282_v42 }
 0x734   :  { %v1284_v46 = vadd.f32 %v1890_v41, %v1283_v45 }
 0x736   :  { %v1293_v47 = vsel %vm1292_vm2, %v1284_v46, %v1131_v14 }
 0x737   :  { %v1294_v48 = vpack.c.bf16 %v1293_v47, %v1293_v47 }
 0x739   :  { %1785 = vmatmul.mubr.msk.bf16.vlgmr.msra.gmra.mxu1 %vm103_vm0, %v1294_v48  ;;  %1793 = vmatmul.mubr.msk.bf16.vlgmr.msra.gmra.mxu0 %vm103_vm0, %v1294_v48 }
 0x73a   :  { %1797 = vmatpush3.bf16.msra.mxu1 %v2152_v8  ;;  %1800 = vmatprep.mubr.msk.bf16.mxu1 %vm2041_vm1, %v2040_v0  ;;  %vm1454_vm1 = vcmp.eq.s32.totalorder %v1453_v19, 1 }
 0x73b   :  { %1798 = vmatprep.subr.bf16.mxu1 %v2040_v0 }
 0x73e   :  { %1799 = vmatpush3.bf16.msra.mxu1 %v2166_v11 }
 0x741   :  { %1801 = vmatmul.mubr.msk.bf16.vlgmr.msra.gmra.mxu1 %vm103_vm0, %v1294_v48 }
 0x7f9   :  { %v1332_v50 = vpop.f32.mrf.mxu1  ;;  %v1372_v51 = vpop.f32.mrf.mxu0 }
 0x7fa   :  { %v1381_v52 = vadd.f32 %v1380_v49, %v1332_v50  ;;  %v1391_v0 = vadd.f32 %v1390_v59, %v1372_v51 }
 0x7fb   :  { %v1786_v53 = vpop.f32.mrf.mxu1  ;;  %v1794_v54 = vpop.f32.mrf.mxu0 }
 0x7fc   :  { %v1536_v55 = vmul.f32 -1.442695, %v1381_v52  ;;  %v1537_v63 = vmul.f32 -1.442695, %v1391_v0 }
 0x7fd   :  { %v1335_v56 = vpop.f32.mrf.mxu1  ;;  %v1375_v57 = vpop.f32.mrf.mxu0 }
 0x7fe   :  { %1893 = vpow2.f32 %v1536_v55 }
 0x7ff   :  { %v1787_v8 = vpop.f32.mrf.mxu1  ;;  %v1795_v58 = vpop.f32.mrf.mxu0  ;;  %1895 = vpow2.f32 %v1537_v63 }
 0x801   :  { %v1435_v60 = vpop.f32.mrf.mxu1 }
 0x802   :  { %v1436_v13 = vadd.f32 %v2202_v37, %v1435_v60 }
 0x803   :  { %v1802_v61 = vpop.f32.mrf.mxu1 }
 0x805   :  { %v1438_v62 = vpop.f32.mrf.mxu1 }
 0x807   :  { %v1803_v11 = vpop.f32.mrf.mxu1 }
 0x80b   :  { %v1894_v4 = vpop.eup %1893 }
 0x80c   :  { %v1385_v6 = vadd.f32 1.0, %v1894_v4  ;;  %v1896_v10 = vpop.eup %1895 }
 0x80d   :  { %v1395_v2 = vadd.f32 1.0, %v1896_v10 }
 0x80e   :  { %1897 = vrcp.f32 %v1385_v6 }
 0x81b   :  { %v1898_v14 = vpop.eup %1897 }
 0x81c   :  { %v1441_v9 = vmul.f32 %v1898_v14, %v1436_v13 }
 0x81e   :  { %v1442_v16 = vadd.f32 %v1441_v9, %v1400_v12 }
 0x820   :  { %1899 = vtanh.f32 %v1442_v16 }
 0x821   :  { %1901 = vrcp.f32 %v1395_v2 }
 0x82d   :  { %v1900_v17 = vpop.eup %1899 }
 0x82e   :  { %v1444_v1 = vsub.f32 %v1293_v47, %v1900_v17  ;;  %v1902_v18 = vpop.eup %1901 }
 0x830   :  { %v1445_v3 = vmul.f32 %v1902_v18, %v1444_v1 }
 0x832   :  { %v1446_v15 = vadd.f32 %v1900_v17, %v1445_v3 }
 0x834   :  { %v1455_v20 = vsel %vm1454_vm1, %v1446_v15, %v1293_v47 }
 0x835   :  { %v1460_v21 = vmul.f32 %v1455_v20, %v1455_v20  ;;  %1456 = vst.msk [vmem:[#allocation2] sm:$0xff] %vm103_vm0, %v1455_v20 }
 0x837   :  { %v1461_v23 = vsel %vm103_vm0, %v1460_v21, 0.0 }
 0x838   :  { %1462 = vadd.xlane.f32.xlu0 %v1461_v23 }
 0x8c1   :  { %v1463_v37 = vpop.xlane.xlu0 %1462 }
 0x8c2   :  { %v1464_v5 = vadd.f32 1e-12, %v1463_v37 }
 0x8c4   :  { %1903 = vrsqrt.f32 %v1464_v5 }
 0x8d1   :  { %v1904_v24 = vpop.eup %1903 }
 0x8d2   :  { %v1466_v25 = vmul.f32 %v1904_v24, %v1455_v20 }
 0x8d4   :  { %1467 = vst.msk [vmem:[#allocation12] sm:$0xff] %vm103_vm0, %v1466_v25 }
 0x8d5   :  { %2016 = shalt.err (!%p2013_p1)
}
 0x8d6   :  { %1477 = dma.vmem_to_hbm [thread:$0]  %s1475_s11, 128, %s2417_s8, [#allocation5]  }
 0x8d7   :  { %2031 = dma.done.wait [#allocation5], 128  }
 0x8d8   :  { %2032 = vsyncadd [#allocation5], 4294967168 }
 0x8d9   :  { %1481 = vsyncpa [#allocation4], 1 }
 0x8da   :  { %1482 = vsyncpa [#allocation7], 1 }
 0x8db   :  { %1483 = vsyncpa [#allocation10], 1 }
 0x8dc   :  { %1484 = vsyncpa [#allocation5], 1 }

</bundles_post_ra>
